<compile_context>
chip_gen: v6e
topology: v6e:2x2x1
jax: 0.10.0
libtpu: 0.0.40
codegen_flags: <defaults>
</compile_context>

<pallas_src>
import jax
import jax.numpy as jnp
from jax.experimental import pallas as pl
from jax.experimental.pallas import tpu as pltpu

# ---------------- config (small synthetic sizes) ----------------
TEXT_EMB = 32        # args.text_embedding
IMAGE_EMB = 64       # args.image_embedding
PROJ_DIM = 32        # args.projection_dim
GRAPH_HID = 64       # SAGE hidden width
GRAPH_EMB = 256      # args.graph_embedding (post_process uses BatchNorm1d(256))
VOCAB = 64
SEQ_LEN = 8
N_SENT = 8           # graph nodes == prescription sentences
N_INFO = 4
N_SENT_TEST = 8
N_INFO_TEST = 4
N_IMG = 8
N_EDGES = 16

N_TXT = N_SENT + N_INFO + N_SENT_TEST + N_INFO_TEST   # 24 : batched sentence rows
N_PROJ = N_IMG + N_TXT                                 # 32 : img + all text projections
OUT_ROWS = N_PROJ + N_SENT                             # 40
OUT_COLS = 128                                         # lane-dense output slab

_VMEM = pl.BlockSpec(memory_space=pltpu.MemorySpace.VMEM)


# ---------------- in-kernel helpers ----------------
def _gelu(x):
    # TODO(synk): PyTorch nn.GELU() default is the exact erf form; the tanh
    # approximation is used here for robust Mosaic lowering (|diff| ~ 1e-3).
    return jax.nn.gelu(x, approximate=True)


def _projection_head(x, w1, b1, w2, b2, gamma, beta):
    """Linear -> GELU -> Linear -> (dropout=id) -> +residual -> LayerNorm."""
    proj = jnp.dot(x, w1, preferred_element_type=jnp.float32) + b1
    h = _gelu(proj)
    h = jnp.dot(h, w2, preferred_element_type=jnp.float32) + b2
    y = h + proj
    mean = jnp.mean(y, axis=-1, keepdims=True)
    var = jnp.mean((y - mean) ** 2, axis=-1, keepdims=True)
    y = (y - mean) * jax.lax.rsqrt(var + 1e-5)
    return y * gamma + beta


# ---------------- the single fused kernel ----------------
def fused_forward_kernel(
    ids_ref, mask_ref, embed_ref, pool_w_ref, pool_b_ref,          # sentences encoder
    img_ref, iw1_ref, ib1_ref, iw2_ref, ib2_ref, ig_ref, ibt_ref,  # image projection
    tw1_ref, tb1_ref, tw2_ref, tb2_ref, tg_ref, tbt_ref,           # text projection
    a_ref, gw1_ref, gb1_ref, gw2_ref, gb2_ref,                     # graph encoder
    pw_ref, pb_ref,                                                # post process
    out_ref,
):
    f32 = jnp.float32

    # --- 1) sentencesTransformer stand-in (all 24 rows batched) ------------------
    # Gather-free embedding lookup: weighted one-hot token counts @ embedding table
    # is exactly the mask-weighted sum of gathered embeddings.
    ids = ids_ref[...]                                   # [N_TXT, SEQ_LEN] int32
    mask = mask_ref[...].astype(f32)                     # [N_TXT, SEQ_LEN]
    vocab_iota = jax.lax.broadcasted_iota(jnp.int32, (1, VOCAB), 1)   # hoisted
    counts = jnp.zeros((N_TXT, VOCAB), f32)
    for l in range(SEQ_LEN):                             # static, fully unrolled
        onehot = (ids[:, l:l + 1] == vocab_iota).astype(f32)          # [N_TXT, VOCAB]
        counts = counts + mask[:, l:l + 1] * onehot
    denom = jnp.maximum(jnp.sum(mask, axis=1, keepdims=True), 1e-9)
    pooled = jnp.dot(counts, embed_ref[...], preferred_element_type=f32) / denom
    sent_all = jnp.tanh(
        jnp.dot(pooled, pool_w_ref[...], preferred_element_type=f32) + pool_b_ref[...]
    )                                                    # [N_TXT, TEXT_EMB]

    # --- 2) projection heads (images + all text groups, batched) -----------------
    img_proj = _projection_head(img_ref[...], iw1_ref[...], ib1_ref[...],
                                iw2_ref[...], ib2_ref[...], ig_ref[...], ibt_ref[...])
    txt_proj = _projection_head(sent_all, tw1_ref[...], tb1_ref[...],
                                tw2_ref[...], tb2_ref[...], tg_ref[...], tbt_ref[...])

    # --- 3) graph encoder: 2x GraphSAGE(mean), matmuls fused as [x | A@x]@[Wl;Wr] --
    x = sent_all[:N_SENT, :]                             # sentences_feature rows
    a = a_ref[...]                                       # [N_SENT, N_SENT] mean-agg
    agg1 = jnp.dot(a, x, preferred_element_type=f32)
    h = jnp.dot(jnp.concatenate([x, agg1], axis=-1), gw1_ref[...],
                preferred_element_type=f32) + gb1_ref[...]
    h = jnp.maximum(h, 0.0)                              # ReLU
    agg2 = jnp.dot(a, h, preferred_element_type=f32)
    g = jnp.dot(jnp.concatenate([h, agg2], axis=-1), gw2_ref[...],
                preferred_element_type=f32) + gb2_ref[...]            # [N_SENT, 256]

    # --- 4) post-process: BatchNorm1d(batch stats, affine=False) -> (dropout=id)
    #        -> Linear(256, 2) -> GELU -> log_softmax ------------------------------
    bmean = jnp.mean(g, axis=0, keepdims=True)
    bvar = jnp.mean((g - bmean) ** 2, axis=0, keepdims=True)
    gn = (g - bmean) * jax.lax.rsqrt(bvar + 1e-5)
    z = jnp.dot(gn, pw_ref[...], preferred_element_type=f32) + pb_ref[...]
    z = _gelu(z)
    m = jnp.max(z, axis=-1, keepdims=True)
    lse = m + jnp.log(jnp.sum(jnp.exp(z - m), axis=-1, keepdims=True))
    graph_log = z - lse                                  # [N_SENT, 2]

    # --- 5) single lane-dense output slab ----------------------------------------
    out_ref[...] = jnp.zeros((OUT_ROWS, OUT_COLS), f32)                  # dense store
    out_ref[0:N_PROJ, 0:PROJ_DIM] = jnp.concatenate([img_proj, txt_proj], axis=0)
    out_ref[N_PROJ:OUT_ROWS, 0:2] = graph_log


# ---------------- wrapper ----------------
def prescription_pill_forward(params, data, bbox_img_features):
    # Batch the 4 shared-weight sentence branches into one 24-row batch.
    ids = jnp.concatenate([data["text_sentences_ids"], data["text_information_ids"],
                           data["text_sentences_test_ids"], data["pill_infors_test_ids"]],
                          axis=0)
    mask = jnp.concatenate([data["text_sentences_mask"], data["text_information_mask"],
                            data["text_sentences_test_mask"], data["pill_infors_test_mask"]],
                           axis=0)

    sp = params["sent"]
    ip = params["img_proj"]
    tp = params["txt_proj"]
    gp = params["graph"]
    pp = params["post"]

    args = (
        ids, mask, sp["embed"], sp["pool_w"], sp["pool_b"],
        bbox_img_features, ip["w1"], ip["b1"], ip["w2"], ip["b2"], ip["ln_g"], ip["ln_b"],
        tp["w1"], tp["b1"], tp["w2"], tp["b2"], tp["ln_g"], tp["ln_b"],
        data["a_mean"], gp["w1"], gp["b1"], gp["w2"], gp["b2"],
        pp["w"], pp["b"],
    )

    out = pl.pallas_call(
        fused_forward_kernel,
        out_shape=jax.ShapeDtypeStruct((OUT_ROWS, OUT_COLS), jnp.float32),
        in_specs=[_VMEM] * len(args),
        out_specs=_VMEM,
        cost_estimate=pl.CostEstimate(flops=1_200_000, transcendentals=4_000,
                                      bytes_accessed=300_000),
    )(*args)

    # Slice the six logical outputs out of the lane-dense slab.
    o = 0
    images_projection = out[o:o + N_IMG, :PROJ_DIM]; o += N_IMG
    sentences_projection = out[o:o + N_SENT, :PROJ_DIM]; o += N_SENT
    sentences_information_projection = out[o:o + N_INFO, :PROJ_DIM]; o += N_INFO
    sentences_all_projection = out[o:o + N_SENT_TEST, :PROJ_DIM]; o += N_SENT_TEST
    sentences_information_all_projection = out[o:o + N_INFO_TEST, :PROJ_DIM]; o += N_INFO_TEST
    graph_extract = out[N_PROJ:OUT_ROWS, :2]
    return (images_projection, sentences_projection, sentences_information_projection,
            sentences_all_projection, sentences_information_all_projection, graph_extract)


# ---------------- deterministic parameter / input construction ----------------
def _dense(key, din, dout, scale=0.02):
    return jax.random.normal(key, (din, dout), jnp.float32) * scale


def init_params(key):
    ks = iter(jax.random.split(key, 20))
    params = {
        "sent": {
            "embed": jax.random.normal(next(ks), (VOCAB, TEXT_EMB), jnp.float32) * 0.02,
            "pool_w": _dense(next(ks), TEXT_EMB, TEXT_EMB),
            "pool_b": jnp.zeros((1, TEXT_EMB), jnp.float32),
        },
        "img_proj": {
            "w1": _dense(next(ks), IMAGE_EMB, PROJ_DIM),
            "b1": jnp.zeros((1, PROJ_DIM), jnp.float32),
            "w2": _dense(next(ks), PROJ_DIM, PROJ_DIM),
            "b2": jnp.zeros((1, PROJ_DIM), jnp.float32),
            "ln_g": jnp.ones((1, PROJ_DIM), jnp.float32),
            "ln_b": jnp.zeros((1, PROJ_DIM), jnp.float32),
        },
        "txt_proj": {
            "w1": _dense(next(ks), TEXT_EMB, PROJ_DIM),
            "b1": jnp.zeros((1, PROJ_DIM), jnp.float32),
            "w2": _dense(next(ks), PROJ_DIM, PROJ_DIM),
            "b2": jnp.zeros((1, PROJ_DIM), jnp.float32),
            "ln_g": jnp.ones((1, PROJ_DIM), jnp.float32),
            "ln_b": jnp.zeros((1, PROJ_DIM), jnp.float32),
        },
        "graph": {
            # fused SAGE weights: [Wl; Wr] stacked on the input axis
            "w1": _dense(next(ks), 2 * TEXT_EMB, GRAPH_HID),
            "b1": jnp.zeros((1, GRAPH_HID), jnp.float32),
            "w2": _dense(next(ks), 2 * GRAPH_HID, GRAPH_EMB),
            "b2": jnp.zeros((1, GRAPH_EMB), jnp.float32),
        },
        "post": {
            "w": _dense(next(ks), GRAPH_EMB, 2),
            "b": jnp.zeros((1, 2), jnp.float32),
        },
    }
    return params


def _make_text(key, n_rows):
    k_ids, k_len = jax.random.split(key)
    ids = jax.random.randint(k_ids, (n_rows, SEQ_LEN), 0, VOCAB, dtype=jnp.int32)
    lens = jax.random.randint(k_len, (n_rows, 1), 1, SEQ_LEN + 1, dtype=jnp.int32)
    mask = (jnp.arange(SEQ_LEN, dtype=jnp.int32)[None, :] < lens).astype(jnp.int32)
    return ids, mask


def build_mean_adj(edge_index, num_nodes):
    src, dst = edge_index[0], edge_index[1]
    a = jnp.zeros((num_nodes, num_nodes), jnp.float32).at[dst, src].add(1.0)
    deg = jnp.maximum(jnp.sum(a, axis=1, keepdims=True), 1.0)
    return a / deg


def make_data(key):
    ks = jax.random.split(key, 6)
    d = {}
    d["text_sentences_ids"], d["text_sentences_mask"] = _make_text(ks[0], N_SENT)
    d["text_information_ids"], d["text_information_mask"] = _make_text(ks[1], N_INFO)
    d["text_sentences_test_ids"], d["text_sentences_test_mask"] = _make_text(ks[2], N_SENT_TEST)
    d["pill_infors_test_ids"], d["pill_infors_test_mask"] = _make_text(ks[3], N_INFO_TEST)
    edge_index = jax.random.randint(ks[4], (2, N_EDGES), 0, N_SENT, dtype=jnp.int32)
    d["a_mean"] = build_mean_adj(edge_index, N_SENT)     # dense mean-aggregation matrix
    bbox_img_features = jax.random.normal(ks[5], (N_IMG, IMAGE_EMB), jnp.float32)
    return d, bbox_img_features


if __name__ == "__main__":
    key = jax.random.PRNGKey(0)
    k_param, k_data = jax.random.split(key)
    params = init_params(k_param)
    data, bbox_img_features = make_data(k_data)

    fwd = jax.jit(prescription_pill_forward)
    outs = fwd(params, data, bbox_img_features)
    outs = jax.block_until_ready(outs)

    expected_shapes = [(N_IMG, PROJ_DIM), (N_SENT, PROJ_DIM), (N_INFO, PROJ_DIM),
                       (N_SENT_TEST, PROJ_DIM), (N_INFO_TEST, PROJ_DIM), (N_SENT, 2)]
    assert [o.shape for o in outs] == expected_shapes, [o.shape for o in outs]
    assert all(bool(jnp.all(jnp.isfinite(o))) for o in outs)
    print("KERNEL_OK")
</pallas_src>

<mosaic_0001>
module attributes {stable_mosaic.version = 11 : i64} {
  func.func @fused_forward_kernel(%arg0: memref<24x8xi32, #tpu.memory_space<vmem>>, %arg1: memref<24x8xi32, #tpu.memory_space<vmem>>, %arg2: memref<64x32xf32, #tpu.memory_space<vmem>>, %arg3: memref<32x32xf32, #tpu.memory_space<vmem>>, %arg4: memref<1x32xf32, #tpu.memory_space<vmem>>, %arg5: memref<8x64xf32, #tpu.memory_space<vmem>>, %arg6: memref<64x32xf32, #tpu.memory_space<vmem>>, %arg7: memref<1x32xf32, #tpu.memory_space<vmem>>, %arg8: memref<32x32xf32, #tpu.memory_space<vmem>>, %arg9: memref<1x32xf32, #tpu.memory_space<vmem>>, %arg10: memref<1x32xf32, #tpu.memory_space<vmem>>, %arg11: memref<1x32xf32, #tpu.memory_space<vmem>>, %arg12: memref<32x32xf32, #tpu.memory_space<vmem>>, %arg13: memref<1x32xf32, #tpu.memory_space<vmem>>, %arg14: memref<32x32xf32, #tpu.memory_space<vmem>>, %arg15: memref<1x32xf32, #tpu.memory_space<vmem>>, %arg16: memref<1x32xf32, #tpu.memory_space<vmem>>, %arg17: memref<1x32xf32, #tpu.memory_space<vmem>>, %arg18: memref<8x8xf32, #tpu.memory_space<vmem>>, %arg19: memref<64x64xf32, #tpu.memory_space<vmem>>, %arg20: memref<1x64xf32, #tpu.memory_space<vmem>>, %arg21: memref<128x256xf32, #tpu.memory_space<vmem>>, %arg22: memref<1x256xf32, #tpu.memory_space<vmem>>, %arg23: memref<256x2xf32, #tpu.memory_space<vmem>>, %arg24: memref<1x2xf32, #tpu.memory_space<vmem>>, %arg25: memref<40x128xf32, #tpu.memory_space<vmem>>) attributes {dimension_semantics = [], scalar_prefetch = 0 : i64, scratch_operands = 0 : i64, tpu.core_type = #tpu.core_type<tc>} {
    %c0 = arith.constant 0 : index
    %c0_0 = arith.constant 0 : index
    %0 = vector.load %arg0[%c0, %c0_0] : memref<24x8xi32, #tpu.memory_space<vmem>>, vector<24x8xi32>
    %c0_1 = arith.constant 0 : index
    %c0_2 = arith.constant 0 : index
    %1 = vector.load %arg1[%c0_1, %c0_2] : memref<24x8xi32, #tpu.memory_space<vmem>>, vector<24x8xi32>
    %2 = arith.sitofp %1 : vector<24x8xi32> to vector<24x8xf32>
    %3 = tpu.iota {dimensions = array<i32: 1>} : vector<1x64xi32>
    %cst = arith.constant 0.000000e+00 : f32
    %4 = vector.broadcast %cst : f32 to vector<24x64xf32>
    %5 = vector.extract_strided_slice %0 {offsets = [0, 0], sizes = [24, 1], strides = [1, 1]} : vector<24x8xi32> to vector<24x1xi32>
    %6 = vector.broadcast %5 : vector<24x1xi32> to vector<24x64xi32>
    %7 = vector.broadcast %3 : vector<1x64xi32> to vector<24x64xi32>
    %8 = arith.cmpi eq, %6, %7 : vector<24x64xi32>
    %9 = arith.extui %8 : vector<24x64xi1> to vector<24x64xi32>
    %10 = arith.sitofp %9 : vector<24x64xi32> to vector<24x64xf32>
    %11 = vector.extract_strided_slice %2 {offsets = [0, 0], sizes = [24, 1], strides = [1, 1]} : vector<24x8xf32> to vector<24x1xf32>
    %12 = vector.broadcast %11 : vector<24x1xf32> to vector<24x64xf32>
    %13 = arith.mulf %12, %10 : vector<24x64xf32>
    %14 = arith.addf %4, %13 : vector<24x64xf32>
    %15 = vector.extract_strided_slice %0 {offsets = [0, 1], sizes = [24, 1], strides = [1, 1]} : vector<24x8xi32> to vector<24x1xi32>
    %16 = vector.broadcast %15 : vector<24x1xi32> to vector<24x64xi32>
    %17 = vector.broadcast %3 : vector<1x64xi32> to vector<24x64xi32>
    %18 = arith.cmpi eq, %16, %17 : vector<24x64xi32>
    %19 = arith.extui %18 : vector<24x64xi1> to vector<24x64xi32>
    %20 = arith.sitofp %19 : vector<24x64xi32> to vector<24x64xf32>
    %21 = vector.extract_strided_slice %2 {offsets = [0, 1], sizes = [24, 1], strides = [1, 1]} : vector<24x8xf32> to vector<24x1xf32>
    %22 = vector.broadcast %21 : vector<24x1xf32> to vector<24x64xf32>
    %23 = arith.mulf %22, %20 : vector<24x64xf32>
    %24 = arith.addf %14, %23 : vector<24x64xf32>
    %25 = vector.extract_strided_slice %0 {offsets = [0, 2], sizes = [24, 1], strides = [1, 1]} : vector<24x8xi32> to vector<24x1xi32>
    %26 = vector.broadcast %25 : vector<24x1xi32> to vector<24x64xi32>
    %27 = vector.broadcast %3 : vector<1x64xi32> to vector<24x64xi32>
    %28 = arith.cmpi eq, %26, %27 : vector<24x64xi32>
    %29 = arith.extui %28 : vector<24x64xi1> to vector<24x64xi32>
    %30 = arith.sitofp %29 : vector<24x64xi32> to vector<24x64xf32>
    %31 = vector.extract_strided_slice %2 {offsets = [0, 2], sizes = [24, 1], strides = [1, 1]} : vector<24x8xf32> to vector<24x1xf32>
    %32 = vector.broadcast %31 : vector<24x1xf32> to vector<24x64xf32>
    %33 = arith.mulf %32, %30 : vector<24x64xf32>
    %34 = arith.addf %24, %33 : vector<24x64xf32>
    %35 = vector.extract_strided_slice %0 {offsets = [0, 3], sizes = [24, 1], strides = [1, 1]} : vector<24x8xi32> to vector<24x1xi32>
    %36 = vector.broadcast %35 : vector<24x1xi32> to vector<24x64xi32>
    %37 = vector.broadcast %3 : vector<1x64xi32> to vector<24x64xi32>
    %38 = arith.cmpi eq, %36, %37 : vector<24x64xi32>
    %39 = arith.extui %38 : vector<24x64xi1> to vector<24x64xi32>
    %40 = arith.sitofp %39 : vector<24x64xi32> to vector<24x64xf32>
    %41 = vector.extract_strided_slice %2 {offsets = [0, 3], sizes = [24, 1], strides = [1, 1]} : vector<24x8xf32> to vector<24x1xf32>
    %42 = vector.broadcast %41 : vector<24x1xf32> to vector<24x64xf32>
    %43 = arith.mulf %42, %40 : vector<24x64xf32>
    %44 = arith.addf %34, %43 : vector<24x64xf32>
    %45 = vector.extract_strided_slice %0 {offsets = [0, 4], sizes = [24, 1], strides = [1, 1]} : vector<24x8xi32> to vector<24x1xi32>
    %46 = vector.broadcast %45 : vector<24x1xi32> to vector<24x64xi32>
    %47 = vector.broadcast %3 : vector<1x64xi32> to vector<24x64xi32>
    %48 = arith.cmpi eq, %46, %47 : vector<24x64xi32>
    %49 = arith.extui %48 : vector<24x64xi1> to vector<24x64xi32>
    %50 = arith.sitofp %49 : vector<24x64xi32> to vector<24x64xf32>
    %51 = vector.extract_strided_slice %2 {offsets = [0, 4], sizes = [24, 1], strides = [1, 1]} : vector<24x8xf32> to vector<24x1xf32>
    %52 = vector.broadcast %51 : vector<24x1xf32> to vector<24x64xf32>
    %53 = arith.mulf %52, %50 : vector<24x64xf32>
    %54 = arith.addf %44, %53 : vector<24x64xf32>
    %55 = vector.extract_strided_slice %0 {offsets = [0, 5], sizes = [24, 1], strides = [1, 1]} : vector<24x8xi32> to vector<24x1xi32>
    %56 = vector.broadcast %55 : vector<24x1xi32> to vector<24x64xi32>
    %57 = vector.broadcast %3 : vector<1x64xi32> to vector<24x64xi32>
    %58 = arith.cmpi eq, %56, %57 : vector<24x64xi32>
    %59 = arith.extui %58 : vector<24x64xi1> to vector<24x64xi32>
    %60 = arith.sitofp %59 : vector<24x64xi32> to vector<24x64xf32>
    %61 = vector.extract_strided_slice %2 {offsets = [0, 5], sizes = [24, 1], strides = [1, 1]} : vector<24x8xf32> to vector<24x1xf32>
    %62 = vector.broadcast %61 : vector<24x1xf32> to vector<24x64xf32>
    %63 = arith.mulf %62, %60 : vector<24x64xf32>
    %64 = arith.addf %54, %63 : vector<24x64xf32>
    %65 = vector.extract_strided_slice %0 {offsets = [0, 6], sizes = [24, 1], strides = [1, 1]} : vector<24x8xi32> to vector<24x1xi32>
    %66 = vector.broadcast %65 : vector<24x1xi32> to vector<24x64xi32>
    %67 = vector.broadcast %3 : vector<1x64xi32> to vector<24x64xi32>
    %68 = arith.cmpi eq, %66, %67 : vector<24x64xi32>
    %69 = arith.extui %68 : vector<24x64xi1> to vector<24x64xi32>
    %70 = arith.sitofp %69 : vector<24x64xi32> to vector<24x64xf32>
    %71 = vector.extract_strided_slice %2 {offsets = [0, 6], sizes = [24, 1], strides = [1, 1]} : vector<24x8xf32> to vector<24x1xf32>
    %72 = vector.broadcast %71 : vector<24x1xf32> to vector<24x64xf32>
    %73 = arith.mulf %72, %70 : vector<24x64xf32>
    %74 = arith.addf %64, %73 : vector<24x64xf32>
    %75 = vector.extract_strided_slice %0 {offsets = [0, 7], sizes = [24, 1], strides = [1, 1]} : vector<24x8xi32> to vector<24x1xi32>
    %76 = vector.broadcast %75 : vector<24x1xi32> to vector<24x64xi32>
    %77 = vector.broadcast %3 : vector<1x64xi32> to vector<24x64xi32>
    %78 = arith.cmpi eq, %76, %77 : vector<24x64xi32>
    %79 = arith.extui %78 : vector<24x64xi1> to vector<24x64xi32>
    %80 = arith.sitofp %79 : vector<24x64xi32> to vector<24x64xf32>
    %81 = vector.extract_strided_slice %2 {offsets = [0, 7], sizes = [24, 1], strides = [1, 1]} : vector<24x8xf32> to vector<24x1xf32>
    %82 = vector.broadcast %81 : vector<24x1xf32> to vector<24x64xf32>
    %83 = arith.mulf %82, %80 : vector<24x64xf32>
    %84 = arith.addf %74, %83 : vector<24x64xf32>
    %cst_3 = arith.constant dense<0.000000e+00> : vector<24xf32>
    %85 = vector.multi_reduction <add>, %2, %cst_3 [1] : vector<24x8xf32> to vector<24xf32>
    %86 = vector.shape_cast %85 : vector<24xf32> to vector<24x1xf32>
    %cst_4 = arith.constant 9.99999971E-10 : f32
    %87 = vector.broadcast %cst_4 : f32 to vector<24x1xf32>
    %88 = arith.maximumf %86, %87 : vector<24x1xf32>
    %c0_5 = arith.constant 0 : index
    %c0_6 = arith.constant 0 : index
    %89 = vector.load %arg2[%c0_5, %c0_6] : memref<64x32xf32, #tpu.memory_space<vmem>>, vector<64x32xf32>
    %cst_7 = arith.constant dense<0.000000e+00> : vector<24x32xf32>
    %90 = tpu.matmul %84, %89, %cst_7 {dimension_numbers = #tpu.dot_dimension_numbers<[1], [0], [0], [1], [0, 0, 1, 1], [], []>} : vector<24x64xf32>, vector<64x32xf32>, vector<24x32xf32> -> vector<24x32xf32>
    %91 = vector.broadcast %88 : vector<24x1xf32> to vector<24x32xf32>
    %92 = arith.divf %90, %91 : vector<24x32xf32>
    %c0_8 = arith.constant 0 : index
    %c0_9 = arith.constant 0 : index
    %93 = vector.load %arg3[%c0_8, %c0_9] : memref<32x32xf32, #tpu.memory_space<vmem>>, vector<32x32xf32>
    %cst_10 = arith.constant dense<0.000000e+00> : vector<24x32xf32>
    %94 = tpu.matmul %92, %93, %cst_10 {dimension_numbers = #tpu.dot_dimension_numbers<[1], [0], [0], [1], [0, 0, 1, 1], [], []>} : vector<24x32xf32>, vector<32x32xf32>, vector<24x32xf32> -> vector<24x32xf32>
    %c0_11 = arith.constant 0 : index
    %c0_12 = arith.constant 0 : index
    %95 = vector.load %arg4[%c0_11, %c0_12] : memref<1x32xf32, #tpu.memory_space<vmem>>, vector<1x32xf32>
    %96 = vector.broadcast %95 : vector<1x32xf32> to vector<24x32xf32>
    %97 = arith.addf %94, %96 : vector<24x32xf32>
    %98 = math.tanh %97 : vector<24x32xf32>
    %c0_13 = arith.constant 0 : index
    %c0_14 = arith.constant 0 : index
    %99 = vector.load %arg5[%c0_13, %c0_14] : memref<8x64xf32, #tpu.memory_space<vmem>>, vector<8x64xf32>
    %c0_15 = arith.constant 0 : index
    %c0_16 = arith.constant 0 : index
    %100 = vector.load %arg6[%c0_15, %c0_16] : memref<64x32xf32, #tpu.memory_space<vmem>>, vector<64x32xf32>
    %c0_17 = arith.constant 0 : index
    %c0_18 = arith.constant 0 : index
    %101 = vector.load %arg7[%c0_17, %c0_18] : memref<1x32xf32, #tpu.memory_space<vmem>>, vector<1x32xf32>
    %c0_19 = arith.constant 0 : index
    %c0_20 = arith.constant 0 : index
    %102 = vector.load %arg8[%c0_19, %c0_20] : memref<32x32xf32, #tpu.memory_space<vmem>>, vector<32x32xf32>
    %c0_21 = arith.constant 0 : index
    %c0_22 = arith.constant 0 : index
    %103 = vector.load %arg9[%c0_21, %c0_22] : memref<1x32xf32, #tpu.memory_space<vmem>>, vector<1x32xf32>
    %c0_23 = arith.constant 0 : index
    %c0_24 = arith.constant 0 : index
    %104 = vector.load %arg10[%c0_23, %c0_24] : memref<1x32xf32, #tpu.memory_space<vmem>>, vector<1x32xf32>
    %c0_25 = arith.constant 0 : index
    %c0_26 = arith.constant 0 : index
    %105 = vector.load %arg11[%c0_25, %c0_26] : memref<1x32xf32, #tpu.memory_space<vmem>>, vector<1x32xf32>
    %cst_27 = arith.constant dense<0.000000e+00> : vector<8x32xf32>
    %106 = tpu.matmul %99, %100, %cst_27 {dimension_numbers = #tpu.dot_dimension_numbers<[1], [0], [0], [1], [0, 0, 1, 1], [], []>} : vector<8x64xf32>, vector<64x32xf32>, vector<8x32xf32> -> vector<8x32xf32>
    %107 = vector.broadcast %101 : vector<1x32xf32> to vector<8x32xf32>
    %108 = arith.addf %106, %107 : vector<8x32xf32>
    %109 = arith.mulf %108, %108 : vector<8x32xf32>
    %110 = arith.mulf %108, %109 : vector<8x32xf32>
    %cst_28 = arith.constant 4.471500e-02 : f32
    %111 = vector.broadcast %cst_28 : f32 to vector<8x32xf32>
    %112 = arith.mulf %111, %110 : vector<8x32xf32>
    %113 = arith.addf %108, %112 : vector<8x32xf32>
    %cst_29 = arith.constant 0.797884583 : f32
    %114 = vector.broadcast %cst_29 : f32 to vector<8x32xf32>
    %115 = arith.mulf %114, %113 : vector<8x32xf32>
    %116 = math.tanh %115 : vector<8x32xf32>
    %cst_30 = arith.constant 1.000000e+00 : f32
    %117 = vector.broadcast %cst_30 : f32 to vector<8x32xf32>
    %118 = arith.addf %117, %116 : vector<8x32xf32>
    %cst_31 = arith.constant 5.000000e-01 : f32
    %119 = vector.broadcast %cst_31 : f32 to vector<8x32xf32>
    %120 = arith.mulf %119, %118 : vector<8x32xf32>
    %121 = arith.mulf %108, %120 : vector<8x32xf32>
    %cst_32 = arith.constant dense<0.000000e+00> : vector<8x32xf32>
    %122 = tpu.matmul %121, %102, %cst_32 {dimension_numbers = #tpu.dot_dimension_numbers<[1], [0], [0], [1], [0, 0, 1, 1], [], []>} : vector<8x32xf32>, vector<32x32xf32>, vector<8x32xf32> -> vector<8x32xf32>
    %123 = vector.broadcast %103 : vector<1x32xf32> to vector<8x32xf32>
    %124 = arith.addf %122, %123 : vector<8x32xf32>
    %125 = arith.addf %124, %108 : vector<8x32xf32>
    %cst_33 = arith.constant dense<0.000000e+00> : vector<8xf32>
    %126 = vector.multi_reduction <add>, %125, %cst_33 [1] : vector<8x32xf32> to vector<8xf32>
    %127 = vector.shape_cast %126 : vector<8xf32> to vector<8x1xf32>
    %cst_34 = arith.constant 3.200000e+01 : f32
    %128 = vector.broadcast %cst_34 : f32 to vector<8x1xf32>
    %129 = arith.divf %127, %128 : vector<8x1xf32>
    %130 = vector.broadcast %129 : vector<8x1xf32> to vector<8x32xf32>
    %131 = arith.subf %125, %130 : vector<8x32xf32>
    %132 = arith.mulf %131, %131 : vector<8x32xf32>
    %cst_35 = arith.constant dense<0.000000e+00> : vector<8xf32>
    %133 = vector.multi_reduction <add>, %132, %cst_35 [1] : vector<8x32xf32> to vector<8xf32>
    %134 = vector.shape_cast %133 : vector<8xf32> to vector<8x1xf32>
    %cst_36 = arith.constant 3.200000e+01 : f32
    %135 = vector.broadcast %cst_36 : f32 to vector<8x1xf32>
    %136 = arith.divf %134, %135 : vector<8x1xf32>
    %137 = vector.broadcast %129 : vector<8x1xf32> to vector<8x32xf32>
    %138 = arith.subf %125, %137 : vector<8x32xf32>
    %cst_37 = arith.constant 9.99999974E-6 : f32
    %139 = vector.broadcast %cst_37 : f32 to vector<8x1xf32>
    %140 = arith.addf %136, %139 : vector<8x1xf32>
    %141 = math.rsqrt %140 : vector<8x1xf32>
    %142 = vector.broadcast %141 : vector<8x1xf32> to vector<8x32xf32>
    %143 = arith.mulf %138, %142 : vector<8x32xf32>
    %144 = vector.broadcast %104 : vector<1x32xf32> to vector<8x32xf32>
    %145 = arith.mulf %143, %144 : vector<8x32xf32>
    %146 = vector.broadcast %105 : vector<1x32xf32> to vector<8x32xf32>
    %147 = arith.addf %145, %146 : vector<8x32xf32>
    %c0_38 = arith.constant 0 : index
    %c0_39 = arith.constant 0 : index
    %148 = vector.load %arg12[%c0_38, %c0_39] : memref<32x32xf32, #tpu.memory_space<vmem>>, vector<32x32xf32>
    %c0_40 = arith.constant 0 : index
    %c0_41 = arith.constant 0 : index
    %149 = vector.load %arg13[%c0_40, %c0_41] : memref<1x32xf32, #tpu.memory_space<vmem>>, vector<1x32xf32>
    %c0_42 = arith.constant 0 : index
    %c0_43 = arith.constant 0 : index
    %150 = vector.load %arg14[%c0_42, %c0_43] : memref<32x32xf32, #tpu.memory_space<vmem>>, vector<32x32xf32>
    %c0_44 = arith.constant 0 : index
    %c0_45 = arith.constant 0 : index
    %151 = vector.load %arg15[%c0_44, %c0_45] : memref<1x32xf32, #tpu.memory_space<vmem>>, vector<1x32xf32>
    %c0_46 = arith.constant 0 : index
    %c0_47 = arith.constant 0 : index
    %152 = vector.load %arg16[%c0_46, %c0_47] : memref<1x32xf32, #tpu.memory_space<vmem>>, vector<1x32xf32>
    %c0_48 = arith.constant 0 : index
    %c0_49 = arith.constant 0 : index
    %153 = vector.load %arg17[%c0_48, %c0_49] : memref<1x32xf32, #tpu.memory_space<vmem>>, vector<1x32xf32>
    %cst_50 = arith.constant dense<0.000000e+00> : vector<24x32xf32>
    %154 = tpu.matmul %98, %148, %cst_50 {dimension_numbers = #tpu.dot_dimension_numbers<[1], [0], [0], [1], [0, 0, 1, 1], [], []>} : vector<24x32xf32>, vector<32x32xf32>, vector<24x32xf32> -> vector<24x32xf32>
    %155 = vector.broadcast %149 : vector<1x32xf32> to vector<24x32xf32>
    %156 = arith.addf %154, %155 : vector<24x32xf32>
    %157 = arith.mulf %156, %156 : vector<24x32xf32>
    %158 = arith.mulf %156, %157 : vector<24x32xf32>
    %cst_51 = arith.constant 4.471500e-02 : f32
    %159 = vector.broadcast %cst_51 : f32 to vector<24x32xf32>
    %160 = arith.mulf %159, %158 : vector<24x32xf32>
    %161 = arith.addf %156, %160 : vector<24x32xf32>
    %cst_52 = arith.constant 0.797884583 : f32
    %162 = vector.broadcast %cst_52 : f32 to vector<24x32xf32>
    %163 = arith.mulf %162, %161 : vector<24x32xf32>
    %164 = math.tanh %163 : vector<24x32xf32>
    %cst_53 = arith.constant 1.000000e+00 : f32
    %165 = vector.broadcast %cst_53 : f32 to vector<24x32xf32>
    %166 = arith.addf %165, %164 : vector<24x32xf32>
    %cst_54 = arith.constant 5.000000e-01 : f32
    %167 = vector.broadcast %cst_54 : f32 to vector<24x32xf32>
    %168 = arith.mulf %167, %166 : vector<24x32xf32>
    %169 = arith.mulf %156, %168 : vector<24x32xf32>
    %cst_55 = arith.constant dense<0.000000e+00> : vector<24x32xf32>
    %170 = tpu.matmul %169, %150, %cst_55 {dimension_numbers = #tpu.dot_dimension_numbers<[1], [0], [0], [1], [0, 0, 1, 1], [], []>} : vector<24x32xf32>, vector<32x32xf32>, vector<24x32xf32> -> vector<24x32xf32>
    %171 = vector.broadcast %151 : vector<1x32xf32> to vector<24x32xf32>
    %172 = arith.addf %170, %171 : vector<24x32xf32>
    %173 = arith.addf %172, %156 : vector<24x32xf32>
    %cst_56 = arith.constant dense<0.000000e+00> : vector<24xf32>
    %174 = vector.multi_reduction <add>, %173, %cst_56 [1] : vector<24x32xf32> to vector<24xf32>
    %175 = vector.shape_cast %174 : vector<24xf32> to vector<24x1xf32>
    %cst_57 = arith.constant 3.200000e+01 : f32
    %176 = vector.broadcast %cst_57 : f32 to vector<24x1xf32>
    %177 = arith.divf %175, %176 : vector<24x1xf32>
    %178 = vector.broadcast %177 : vector<24x1xf32> to vector<24x32xf32>
    %179 = arith.subf %173, %178 : vector<24x32xf32>
    %180 = arith.mulf %179, %179 : vector<24x32xf32>
    %cst_58 = arith.constant dense<0.000000e+00> : vector<24xf32>
    %181 = vector.multi_reduction <add>, %180, %cst_58 [1] : vector<24x32xf32> to vector<24xf32>
    %182 = vector.shape_cast %181 : vector<24xf32> to vector<24x1xf32>
    %cst_59 = arith.constant 3.200000e+01 : f32
    %183 = vector.broadcast %cst_59 : f32 to vector<24x1xf32>
    %184 = arith.divf %182, %183 : vector<24x1xf32>
    %185 = vector.broadcast %177 : vector<24x1xf32> to vector<24x32xf32>
    %186 = arith.subf %173, %185 : vector<24x32xf32>
    %cst_60 = arith.constant 9.99999974E-6 : f32
    %187 = vector.broadcast %cst_60 : f32 to vector<24x1xf32>
    %188 = arith.addf %184, %187 : vector<24x1xf32>
    %189 = math.rsqrt %188 : vector<24x1xf32>
    %190 = vector.broadcast %189 : vector<24x1xf32> to vector<24x32xf32>
    %191 = arith.mulf %186, %190 : vector<24x32xf32>
    %192 = vector.broadcast %152 : vector<1x32xf32> to vector<24x32xf32>
    %193 = arith.mulf %191, %192 : vector<24x32xf32>
    %194 = vector.broadcast %153 : vector<1x32xf32> to vector<24x32xf32>
    %195 = arith.addf %193, %194 : vector<24x32xf32>
    %196 = vector.extract_strided_slice %98 {offsets = [0, 0], sizes = [8, 32], strides = [1, 1]} : vector<24x32xf32> to vector<8x32xf32>
    %c0_61 = arith.constant 0 : index
    %c0_62 = arith.constant 0 : index
    %197 = vector.load %arg18[%c0_61, %c0_62] : memref<8x8xf32, #tpu.memory_space<vmem>>, vector<8x8xf32>
    %cst_63 = arith.constant dense<0.000000e+00> : vector<8x32xf32>
    %198 = tpu.matmul %197, %196, %cst_63 {dimension_numbers = #tpu.dot_dimension_numbers<[1], [0], [0], [1], [0, 0, 1, 1], [], []>} : vector<8x8xf32>, vector<8x32xf32>, vector<8x32xf32> -> vector<8x32xf32>
    %199 = tpu.concatenate %196, %198 in 1 : vector<8x32xf32>, vector<8x32xf32> -> vector<8x64xf32>
    %c0_64 = arith.constant 0 : index
    %c0_65 = arith.constant 0 : index
    %200 = vector.load %arg19[%c0_64, %c0_65] : memref<64x64xf32, #tpu.memory_space<vmem>>, vector<64x64xf32>
    %cst_66 = arith.constant dense<0.000000e+00> : vector<8x64xf32>
    %201 = tpu.matmul %199, %200, %cst_66 {dimension_numbers = #tpu.dot_dimension_numbers<[1], [0], [0], [1], [0, 0, 1, 1], [], []>} : vector<8x64xf32>, vector<64x64xf32>, vector<8x64xf32> -> vector<8x64xf32>
    %c0_67 = arith.constant 0 : index
    %c0_68 = arith.constant 0 : index
    %202 = vector.load %arg20[%c0_67, %c0_68] : memref<1x64xf32, #tpu.memory_space<vmem>>, vector<1x64xf32>
    %203 = vector.broadcast %202 : vector<1x64xf32> to vector<8x64xf32>
    %204 = arith.addf %201, %203 : vector<8x64xf32>
    %cst_69 = arith.constant 0.000000e+00 : f32
    %205 = vector.broadcast %cst_69 : f32 to vector<8x64xf32>
    %206 = arith.maximumf %204, %205 : vector<8x64xf32>
    %cst_70 = arith.constant dense<0.000000e+00> : vector<8x64xf32>
    %207 = tpu.matmul %197, %206, %cst_70 {dimension_numbers = #tpu.dot_dimension_numbers<[1], [0], [0], [1], [0, 0, 1, 1], [], []>} : vector<8x8xf32>, vector<8x64xf32>, vector<8x64xf32> -> vector<8x64xf32>
    %208 = tpu.concatenate %206, %207 in 1 : vector<8x64xf32>, vector<8x64xf32> -> vector<8x128xf32>
    %c0_71 = arith.constant 0 : index
    %c0_72 = arith.constant 0 : index
    %209 = vector.load %arg21[%c0_71, %c0_72] : memref<128x256xf32, #tpu.memory_space<vmem>>, vector<128x256xf32>
    %cst_73 = arith.constant dense<0.000000e+00> : vector<8x256xf32>
    %210 = tpu.matmul %208, %209, %cst_73 {dimension_numbers = #tpu.dot_dimension_numbers<[1], [0], [0], [1], [0, 0, 1, 1], [], []>} : vector<8x128xf32>, vector<128x256xf32>, vector<8x256xf32> -> vector<8x256xf32>
    %c0_74 = arith.constant 0 : index
    %c0_75 = arith.constant 0 : index
    %211 = vector.load %arg22[%c0_74, %c0_75] : memref<1x256xf32, #tpu.memory_space<vmem>>, vector<1x256xf32>
    %212 = vector.broadcast %211 : vector<1x256xf32> to vector<8x256xf32>
    %213 = arith.addf %210, %212 : vector<8x256xf32>
    %cst_76 = arith.constant dense<0.000000e+00> : vector<256xf32>
    %214 = vector.multi_reduction <add>, %213, %cst_76 [0] : vector<8x256xf32> to vector<256xf32>
    %215 = vector.shape_cast %214 : vector<256xf32> to vector<1x256xf32>
    %cst_77 = arith.constant 8.000000e+00 : f32
    %216 = vector.broadcast %cst_77 : f32 to vector<1x256xf32>
    %217 = arith.divf %215, %216 : vector<1x256xf32>
    %218 = vector.broadcast %217 : vector<1x256xf32> to vector<8x256xf32>
    %219 = arith.subf %213, %218 : vector<8x256xf32>
    %220 = arith.mulf %219, %219 : vector<8x256xf32>
    %cst_78 = arith.constant dense<0.000000e+00> : vector<256xf32>
    %221 = vector.multi_reduction <add>, %220, %cst_78 [0] : vector<8x256xf32> to vector<256xf32>
    %222 = vector.shape_cast %221 : vector<256xf32> to vector<1x256xf32>
    %cst_79 = arith.constant 8.000000e+00 : f32
    %223 = vector.broadcast %cst_79 : f32 to vector<1x256xf32>
    %224 = arith.divf %222, %223 : vector<1x256xf32>
    %225 = vector.broadcast %217 : vector<1x256xf32> to vector<8x256xf32>
    %226 = arith.subf %213, %225 : vector<8x256xf32>
    %cst_80 = arith.constant 9.99999974E-6 : f32
    %227 = vector.broadcast %cst_80 : f32 to vector<1x256xf32>
    %228 = arith.addf %224, %227 : vector<1x256xf32>
    %229 = math.rsqrt %228 : vector<1x256xf32>
    %230 = vector.broadcast %229 : vector<1x256xf32> to vector<8x256xf32>
    %231 = arith.mulf %226, %230 : vector<8x256xf32>
    %c0_81 = arith.constant 0 : index
    %c0_82 = arith.constant 0 : index
    %232 = vector.load %arg23[%c0_81, %c0_82] : memref<256x2xf32, #tpu.memory_space<vmem>>, vector<256x2xf32>
    %cst_83 = arith.constant dense<0.000000e+00> : vector<8x2xf32>
    %233 = tpu.matmul %231, %232, %cst_83 {dimension_numbers = #tpu.dot_dimension_numbers<[1], [0], [0], [1], [0, 0, 1, 1], [], []>} : vector<8x256xf32>, vector<256x2xf32>, vector<8x2xf32> -> vector<8x2xf32>
    %c0_84 = arith.constant 0 : index
    %c0_85 = arith.constant 0 : index
    %234 = vector.load %arg24[%c0_84, %c0_85] : memref<1x2xf32, #tpu.memory_space<vmem>>, vector<1x2xf32>
    %235 = vector.broadcast %234 : vector<1x2xf32> to vector<8x2xf32>
    %236 = arith.addf %233, %235 : vector<8x2xf32>
    %237 = arith.mulf %236, %236 : vector<8x2xf32>
    %238 = arith.mulf %236, %237 : vector<8x2xf32>
    %cst_86 = arith.constant 4.471500e-02 : f32
    %239 = vector.broadcast %cst_86 : f32 to vector<8x2xf32>
    %240 = arith.mulf %239, %238 : vector<8x2xf32>
    %241 = arith.addf %236, %240 : vector<8x2xf32>
    %cst_87 = arith.constant 0.797884583 : f32
    %242 = vector.broadcast %cst_87 : f32 to vector<8x2xf32>
    %243 = arith.mulf %242, %241 : vector<8x2xf32>
    %244 = math.tanh %243 : vector<8x2xf32>
    %cst_88 = arith.constant 1.000000e+00 : f32
    %245 = vector.broadcast %cst_88 : f32 to vector<8x2xf32>
    %246 = arith.addf %245, %244 : vector<8x2xf32>
    %cst_89 = arith.constant 5.000000e-01 : f32
    %247 = vector.broadcast %cst_89 : f32 to vector<8x2xf32>
    %248 = arith.mulf %247, %246 : vector<8x2xf32>
    %249 = arith.mulf %236, %248 : vector<8x2xf32>
    %cst_90 = arith.constant dense<0xFF800000> : vector<8xf32>
    %250 = vector.multi_reduction <maximumf>, %249, %cst_90 [1] : vector<8x2xf32> to vector<8xf32>
    %251 = vector.shape_cast %250 : vector<8xf32> to vector<8x1xf32>
    %252 = vector.broadcast %251 : vector<8x1xf32> to vector<8x2xf32>
    %253 = arith.subf %249, %252 : vector<8x2xf32>
    %254 = math.exp %253 : vector<8x2xf32>
    %cst_91 = arith.constant dense<0.000000e+00> : vector<8xf32>
    %255 = vector.multi_reduction <add>, %254, %cst_91 [1] : vector<8x2xf32> to vector<8xf32>
    %256 = vector.shape_cast %255 : vector<8xf32> to vector<8x1xf32>
    %257 = math.log %256 : vector<8x1xf32>
    %258 = arith.addf %251, %257 : vector<8x1xf32>
    %259 = vector.broadcast %258 : vector<8x1xf32> to vector<8x2xf32>
    %260 = arith.subf %249, %259 : vector<8x2xf32>
    %cst_92 = arith.constant 0.000000e+00 : f32
    %261 = vector.broadcast %cst_92 : f32 to vector<40x128xf32>
    %c0_93 = arith.constant 0 : index
    %c0_94 = arith.constant 0 : index
    %262 = vector.load %arg25[%c0_93, %c0_94] : memref<40x128xf32, #tpu.memory_space<vmem>>, vector<40x128xf32>
    tpu.vector_store %arg25[%c0_93, %c0_94], %261 {strides = array<i32>} : memref<40x128xf32, #tpu.memory_space<vmem>>, vector<40x128xf32>,
    %263 = tpu.concatenate %147, %195 in 0 : vector<8x32xf32>, vector<24x32xf32> -> vector<32x32xf32>
    %c0_95 = arith.constant 0 : index
    %c0_96 = arith.constant 0 : index
    %264 = vector.load %arg25[%c0_95, %c0_96] : memref<40x128xf32, #tpu.memory_space<vmem>>, vector<32x32xf32>
    tpu.vector_store %arg25[%c0_95, %c0_96], %263 {strides = array<i32>} : memref<40x128xf32, #tpu.memory_space<vmem>>, vector<32x32xf32>,
    %c32 = arith.constant 32 : index
    %c0_97 = arith.constant 0 : index
    %265 = vector.load %arg25[%c32, %c0_97] : memref<40x128xf32, #tpu.memory_space<vmem>>, vector<8x2xf32>
    tpu.vector_store %arg25[%c32, %c0_97], %260 {strides = array<i32>} : memref<40x128xf32, #tpu.memory_space<vmem>>, vector<8x2xf32>,
    return
  }
}

</mosaic_0001>

<bundles_post_ra>
// kernel: prescription_pill_forward.1
= control target key start
LH: loop header
LB: loop body
LE: loop exit
PB: predicated region body
PF: predicated region fallthrough
CT: control target
= control target key end

     0   :  { %v2017_v0 = vmov 1   ;;  %v2018_v2 = vmov 0   ;;  %v2019_v6 = vmov 0.0   ;;  %v2020_v7 = vmov 2   ;;  %s2938_s0 = inlined_call_operand.vmem [shape: s32[24,8], index: 0, kind: input, shape index: {}]   ;;  %s2939_s1 = inlined_call_operand.vmem [shape: s32[24,8], index: 1, kind: input, shape index: {}]   ;;  %s2940_s2 = inlined_call_operand.vmem [shape: f32[64,32], index: 2, kind: input, shape index: {}]   ;;  %s2941_s3 = inlined_call_operand.vmem [shape: f32[32,32], index: 3, kind: input, shape index: {}]   ;;  %s2942_s6 = inlined_call_operand.vmem [shape: f32[64,32], index: 6, kind: input, shape index: {}]   ;;  %s2943_s5 = inlined_call_operand.vmem [shape: f32[8,64], index: 5, kind: input, shape index: {}]   ;;  %s2944_s12 = inlined_call_operand.vmem [shape: f32[32,32], index: 12, kind: input, shape index: {}]   ;;  %s2945_s8 = inlined_call_operand.vmem [shape: f32[32,32], index: 8, kind: input, shape index: {}]   ;;  %s2946_s4 = inlined_call_operand.vmem [shape: f32[1,32], index: 4, kind: input, shape index: {}]   ;;  %s2947_s7 = inlined_call_operand.vmem [shape: f32[1,32], index: 7, kind: input, shape index: {}]   ;;  %s2948_s18 = inlined_call_operand.vmem [shape: f32[8,8], index: 18, kind: input, shape index: {}]   ;;  %s2949_s14 = inlined_call_operand.vmem [shape: f32[32,32], index: 14, kind: input, shape index: {}]   ;;  %s2950_s13 = inlined_call_operand.vmem [shape: f32[1,32], index: 13, kind: input, shape index: {}]   ;;  %s2951_s19 = inlined_call_operand.vmem [shape: f32[64,64], index: 19, kind: input, shape index: {}]   ;;  %s2952_s9 = inlined_call_operand.vmem [shape: f32[1,32], index: 9, kind: input, shape index: {}]   ;;  %s2953_s15 = inlined_call_operand.vmem [shape: f32[1,32], index: 15, kind: input, shape index: {}]   ;;  %s2954_s25 = inlined_call_operand.vmem [shape: f32[40,128], index: 25, kind: output, shape index: {}]   ;;  %s2955_s20 = inlined_call_operand.vmem [shape: f32[1,64], index: 20, kind: input, shape index: {}]   ;;  %s2956_s21 = inlined_call_operand.vmem [shape: f32[128,256], index: 21, kind: input, shape index: {}]   ;;  %s2957_s16 = inlined_call_operand.vmem [shape: f32[1,32], index: 16, kind: input, shape index: {}]   ;;  %s2958_s17 = inlined_call_operand.vmem [shape: f32[1,32], index: 17, kind: input, shape index: {}]   ;;  %s2959_s23 = inlined_call_operand.vmem [shape: f32[256,2], index: 23, kind: input, shape index: {}]   ;;  %s2960_s22 = inlined_call_operand.vmem [shape: f32[1,256], index: 22, kind: input, shape index: {}]   ;;  %s2961_s24 = inlined_call_operand.vmem [shape: f32[1,2], index: 24, kind: input, shape index: {}]   ;;  %s2962_s10 = inlined_call_operand.vmem [shape: f32[1,32], index: 10, kind: input, shape index: {}]   ;;  %s2963_s11 = inlined_call_operand.vmem [shape: f32[1,32], index: 11, kind: input, shape index: {}]  }
   0x1   :  { %2971 = sst [smem:[#allocation2_spill]] %s2938_s0  ;;  %1941 = vset.pattern.permute.xlu0 %v2017_v0  ;;  %1942 = vset.pattern.permute.xlu1 %v2018_v2  ;;  %v2021_v13 = vmov 3   ;;  %v2022_v14 = vmov 6   ;;  %v2023_v15 = vmov 4   ;;  %v2024_v16 = vmov 5   ;;  %1635 = vst [vmem:[%s2954_s25 + $0x8] sm:$0xff] %v2019_v6  ;;  %1634 = vst [vmem:[%s2954_s25] sm:$0xff] %v2019_v6 }
   0x2   :  { %2972 = sst [smem:[#allocation3_spill]] %s2939_s1  ;;  %1794 = vmatprep.subr.mxu0 %v2019_v6  ;;  %1819 = vmatprep.subr.mxu1 %v2019_v6  ;;  %v2025_v17 = vmov 7   ;;  %v89_v26 = vlaneseq  ;;  %vm2026_vm0 = vmmov 0   ;;  %vm382_vm5 = vcmask 64512   ;;  %1636 = vst [vmem:[%s2954_s25 + $0x10] sm:$0xff] %v2019_v6  ;;  %1637 = vst [vmem:[%s2954_s25 + $0x18] sm:$0xff] %v2019_v6 }
   0x3   :  { %2973 = sst [smem:[#allocation4_spill]] %s2940_s2  ;;  %1810 = vmatprep.mubr.msk.f32.mxu0 %vm2026_vm0, %v2019_v6  ;;  %1827 = vmatprep.mubr.msk.f32.mxu1 %vm2026_vm0, %v2019_v6  ;;  %1638 = vst [vmem:[%s2954_s25 + $0x20] sm:$0xff] %v2019_v6 }
   0x4   :  { %2974 = sst [smem:[#allocation5_spill]] %s2941_s3  ;;  %v2291_v29 = vand.u32 127, %v89_v26 }
   0x5   :  { %2975 = sst [smem:[#allocation6_spill]] %s2942_s6 }
   0x6   :  { %2976 = sst [smem:[#allocation7_spill]] %s2943_s5 }
   0x7   :  { %2977 = sst [smem:[#allocation8_spill]] %s2944_s12 }
   0x8   :  { %2978 = sst [smem:[#allocation9_spill]] %s2945_s8 }
   0x9   :  { %2979 = sst [smem:[#allocation10_spill]] %s2946_s4 }
   0xa   :  { %2980 = sst [smem:[#allocation11_spill]] %s2947_s7 }
   0xb   :  { %s2981_s12 = sld [smem:[#allocation2_spill]] }
   0xc   :  { %s2982_s3 = sld [smem:[#allocation3_spill]] }
   0xd   :  { %s2983_s2 = sld [smem:[#allocation4_spill]] }
   0xe   :  { %s2984_s30 = sld [smem:[#allocation5_spill]] }
   0xf   :  { %s2985_s7 = sld [smem:[#allocation6_spill]] }
  0x10   :  { %s2986_s0 = sld [smem:[#allocation7_spill]] }
  0x11   :  { %v2163_v1 = vld [vmem:[%s2981_s12] sm:$0xff]  ;;  %v2175_v5 = vld [vmem:[%s2981_s12 + $0x8] sm:$0xff]  ;;  %v2190_v8 = vld [vmem:[%s2981_s12 + $0x10] sm:$0xff]  ;;  %s2987_s12 = sld [smem:[#allocation8_spill]] }
  0x12   :  { %v83_v3 = vld [vmem:[%s2982_s3] sm:$0xff]  ;;  %131 = vperm.xlu0 %1941, %v2163_v1   ;;  %v85_v9 = vld [vmem:[%s2982_s3 + $0x10] sm:$0xff]  ;;  %v84_v11 = vld [vmem:[%s2982_s3 + $0x8] sm:$0xff]  ;;  %s2988_s28 = sld [smem:[#allocation9_spill]] }
  0x13   :  { %v2169_v4 = vcvt.s32.f32 %v83_v3  ;;  %v2198_v10 = vcvt.s32.f32 %v85_v9  ;;  %v2206_v12 = vcvt.s32.f32 %v84_v11  ;;  %v402_v18 = vld [vmem:[%s2983_s2 + $0x38] sm:$0xff]  ;;  %v401_v19 = vld [vmem:[%s2983_s2 + $0x30] sm:$0xff]  ;;  %v400_v20 = vld [vmem:[%s2983_s2 + $0x28] sm:$0xff]  ;;  %s2989_s3 = sld [smem:[#allocation10_spill]] }
  0x14   :  { %1795 = vmatpush3.msra.mxu0 %v402_v18  ;;  %v399_v21 = vld [vmem:[%s2983_s2 + $0x20] sm:$0xff]  ;;  %v398_v22 = vld [vmem:[%s2983_s2 + $0x18] sm:$0xff]  ;;  %v397_v23 = vld [vmem:[%s2983_s2 + $0x10] sm:$0xff]  ;;  %s2990_s4 = sld [smem:[#allocation11_spill]] }
  0x15   :  { %111 = vperm.xlu1 %1942, %v2169_v4   ;;  %1796 = vmatprep.subr.mxu0 %v2019_v6  ;;  %v396_v24 = vld [vmem:[%s2983_s2 + $0x8] sm:$0xff]  ;;  %v395_v25 = vld [vmem:[%s2983_s2] sm:$0xff]  ;;  %v383_v46 = vsel %vm382_vm5, %v2169_v4, 0.0  ;;  %v389_v48 = vsel %vm382_vm5, %v2198_v10, 0.0  ;;  %v502_v56 = vld [vmem:[%s2984_s30 + $0x18] sm:$0xff]  ;;  %v386_v60 = vsel %vm382_vm5, %v2206_v12, 0.0 }
  0x16   :  { %1949 = vset.pattern.permute.xlu0 %v2020_v7  ;;  %1797 = vmatpush3.msra.mxu0 %v401_v19  ;;  %s2028_s2 = smov 64  }
  0x17   :  { %170 = vperm.xlu0 %1949, %v2175_v5   ;;  %1798 = vmatprep.subr.mxu0 %v2019_v6 }
  0x18   :  { %1799 = vmatpush3.msra.mxu0 %v400_v20  ;;  %1820 = vmatpush3.msra.mxu1 %v502_v56 }
  0x19   :  { %1943 = vset.pattern.permute.xlu1 %v2017_v0  ;;  %1800 = vmatprep.subr.mxu0 %v2019_v6 }
  0x1a   :  { %149 = vperm.xlu1 %1943, %v2169_v4   ;;  %1801 = vmatpush3.msra.mxu0 %v399_v21 }
  0x1b   :  { %1950 = vset.pattern.permute.xlu0 %v2018_v2  ;;  %1802 = vmatprep.subr.mxu0 %v2019_v6 }
  0x1c   :  { %92 = vperm.xlu0 %1950, %v2163_v1   ;;  %1803 = vmatpush3.msra.mxu0 %v398_v22 }
  0x1d   :  { %1804 = vmatprep.subr.mxu0 %v2019_v6  ;;  %1821 = vmatprep.subr.mxu1 %v2019_v6 }
  0x1e   :  { %1944 = vset.pattern.permute.xlu1 %v2020_v7  ;;  %1805 = vmatpush3.msra.mxu0 %v397_v23 }
  0x1f   :  { %167 = vperm.xlu1 %1944, %v2163_v1   ;;  %1806 = vmatprep.subr.mxu0 %v2019_v6 }
  0x20   :  { %95 = vperm.xlu0 %1950, %v2175_v5   ;;  %1807 = vmatpush3.msra.mxu0 %v396_v24 }
  0x21   :  { %1808 = vmatprep.subr.mxu0 %v2019_v6 }
  0x22   :  { %1809 = vmatpush3.msra.mxu0 %v395_v25 }
  0x23   :  { %1945 = vset.pattern.permute.xlu1 %v2017_v0  ;;  %1855 = vmatprep.subr.mxu0 %v2019_v6 }
  0x24   :  { %134 = vperm.xlu1 %1945, %v2175_v5   ;;  %98 = vperm.xlu0 %1950, %v2190_v8  }
  0x28   :  { %1946 = vset.pattern.permute.xlu1 %v2020_v7  ;;  %121 = vperm.xlu0 %1950, %v2198_v10  }
  0x29   :  { %185 = vperm.xlu1 %1946, %v2169_v4  }
  0x2c   :  { %1957 = vset.pattern.permute.xlu0 %v2021_v13 }
  0x2d   :  { %1947 = vset.pattern.permute.xlu1 %v2018_v2  ;;  %203 = vperm.xlu0 %1957, %v2163_v1   ;;  %v501_v2 = vld [vmem:[%s2984_s30 + $0x10] sm:$0xff] }
  0x2e   :  { %116 = vperm.xlu1 %1947, %v2206_v12   ;;  %1822 = vmatpush3.msra.mxu1 %v501_v2 }
  0x2f   :  { %1823 = vmatprep.subr.mxu1 %v2019_v6 }
  0x31   :  { %206 = vperm.xlu0 %1957, %v2175_v5  }
  0x32   :  { %1948 = vset.pattern.permute.xlu1 %v2017_v0 }
  0x33   :  { %153 = vperm.xlu1 %1948, %v2206_v12  }
  0x35   :  { %225 = vperm.xlu0 %1957, %v2206_v12  }
  0x37   :  { %1951 = vset.pattern.permute.xlu1 %v2021_v13 }
  0x38   :  { %221 = vperm.xlu1 %1951, %v2169_v4  }
  0x39   :  { %1962 = vset.pattern.permute.xlu0 %v2022_v14 }
  0x3a   :  { %311 = vperm.xlu0 %1962, %v2163_v1  }
  0x3c   :  { %1952 = vset.pattern.permute.xlu1 %v2023_v15 }
  0x3d   :  { %239 = vperm.xlu1 %1952, %v2163_v1  }
  0x3e   :  { %1969 = vset.pattern.permute.xlu0 %v2024_v16 }
  0x3f   :  { %297 = vperm.xlu0 %1969, %v2206_v12  }
  0x41   :  { %1953 = vset.pattern.permute.xlu1 %v2017_v0 }
  0x42   :  { %137 = vperm.xlu1 %1953, %v2190_v8  }
  0x43   :  { %1970 = vset.pattern.permute.xlu0 %v2023_v15 }
  0x44   :  { %261 = vperm.xlu0 %1970, %v2206_v12  }
  0x46   :  { %1954 = vset.pattern.permute.xlu1 %v2020_v7 }
  0x47   :  { %189 = vperm.xlu1 %1954, %v2206_v12  }
  0x48   :  { %265 = vperm.xlu0 %1970, %v2198_v10  }
  0x4b   :  { %1955 = vset.pattern.permute.xlu1 %v2023_v15 }
  0x4c   :  { %257 = vperm.xlu1 %1955, %v2169_v4   ;;  %1973 = vset.pattern.permute.xlu0 %v2025_v17 }
  0x4d   :  { %347 = vperm.xlu0 %1973, %v2163_v1  }
  0x50   :  { %1956 = vset.pattern.permute.xlu1 %v2024_v16 }
  0x51   :  { %275 = vperm.xlu1 %1956, %v2163_v1   ;;  %350 = vperm.xlu0 %1973, %v2175_v5  }
  0x55   :  { %1958 = vset.pattern.permute.xlu1 %v2017_v0  ;;  %369 = vperm.xlu0 %1973, %v2206_v12  }
  0x56   :  { %157 = vperm.xlu1 %1958, %v2198_v10  }
  0x59   :  { %353 = vperm.xlu0 %1973, %v2190_v8  }
  0x5a   :  { %1959 = vset.pattern.permute.xlu1 %v2020_v7 }
  0x5b   :  { %173 = vperm.xlu1 %1959, %v2190_v8  }
  0x5f   :  { %1960 = vset.pattern.permute.xlu1 %v2023_v15 }
  0x60   :  { %242 = vperm.xlu1 %1960, %v2175_v5  }
  0x64   :  { %1961 = vset.pattern.permute.xlu1 %v2024_v16 }
  0x65   :  { %293 = vperm.xlu1 %1961, %v2169_v4  }
  0x69   :  { %1963 = vset.pattern.permute.xlu1 %v2020_v7 }
  0x6a   :  { %193 = vperm.xlu1 %1963, %v2198_v10  }
  0x6e   :  { %1964 = vset.pattern.permute.xlu1 %v2021_v13 }
  0x6f   :  { %209 = vperm.xlu1 %1964, %v2190_v8  }
  0x73   :  { %1965 = vset.pattern.permute.xlu1 %v2024_v16 }
  0x74   :  { %278 = vperm.xlu1 %1965, %v2175_v5  }
  0x78   :  { %1966 = vset.pattern.permute.xlu1 %v2022_v14  ;;  %384 = vadd.xlane.f32.xlu0 %v383_v46 }
  0x79   :  { %329 = vperm.xlu1 %1966, %v2169_v4  }
  0x7c   :  { %390 = vadd.xlane.f32.xlu0 %v389_v48 }
  0x7d   :  { %1967 = vset.pattern.permute.xlu1 %v2021_v13 }
  0x7e   :  { %229 = vperm.xlu1 %1967, %v2198_v10  }
  0x82   :  { %1968 = vset.pattern.permute.xlu1 %v2023_v15 }
  0x83   :  { %245 = vperm.xlu1 %1968, %v2190_v8  }
  0x87   :  { %1971 = vset.pattern.permute.xlu1 %v2022_v14 }
  0x88   :  { %314 = vperm.xlu1 %1971, %v2175_v5  }
  0x8c   :  { %1972 = vset.pattern.permute.xlu1 %v2025_v17 }
  0x8d   :  { %365 = vperm.xlu1 %1972, %v2169_v4   ;;  %v132_v27 = vpop.permute.xlu0 %131 }
  0x8e   :  { %vm139_vm1 = vcmp.eq.s32.totalorder %v132_v27, %v2291_v29 }
  0x8f   :  { %v1651_v32 = vsel %vm139_vm1, 1.0, %v2019_v6  ;;  %vm403_vm1 = vcmask 523264  }
  0x90   :  { %v112_v28 = vpop.permute.xlu1 %111 }
  0x91   :  { %1974 = vset.pattern.permute.xlu1 %v2024_v16 }
  0x92   :  { %281 = vperm.xlu1 %1974, %v2190_v8   ;;  %v2295_v30 = vpop.permute.xlu0 %170 }
  0x93   :  { %vm176_vm11 = vcmp.eq.s32.totalorder %v2295_v30, %v2291_v29 }
  0x95   :  { %v150_v31 = vpop.permute.xlu1 %149 }
  0x96   :  { %1975 = vset.pattern.permute.xlu1 %v2022_v14  ;;  %v160_v36 = vmul.f32 %v1651_v32, %v150_v31  ;;  %v1655_v32 = vsel %vm176_vm11, 1.0, %v2019_v6 }
  0x97   :  { %333 = vperm.xlu1 %1975, %v2206_v12   ;;  %v93_v33 = vpop.permute.xlu0 %92 }
  0x98   :  { %vm100_vm2 = vcmp.eq.s32.totalorder %v93_v33, %v2291_v29 }
  0x99   :  { %v1648_v34 = vsel %vm100_vm2, 1.0, %v2019_v6 }
  0x9a   :  { %v168_v35 = vpop.permute.xlu1 %167  ;;  %v124_v37 = vmul.f32 %v1648_v34, %v112_v28 }
  0x9b   :  { %1976 = vset.pattern.permute.xlu1 %v2024_v16  ;;  %vm175_vm3 = vcmp.eq.s32.totalorder %v168_v35, %v2291_v29  ;;  %v96_v44 = vpop.permute.xlu0 %95 }
  0x9c   :  { %301 = vperm.xlu1 %1976, %v2198_v10   ;;  %v163_v38 = vadd.f32 %v160_v36, %v124_v37  ;;  %v1654_v40 = vsel %vm175_vm3, 1.0, %v2019_v6  ;;  %vm101_vm4 = vcmp.eq.s32.totalorder %v96_v44, %v2291_v29 }
  0x9d   :  { %v1649_v47 = vsel %vm101_vm4, 1.0, %v2019_v6 }
  0x9f   :  { %v135_v39 = vpop.permute.xlu1 %134  ;;  %v2334_v63 = vpop.permute.xlu0 %98 }
  0xa0   :  { %1977 = vset.pattern.permute.xlu1 %v2022_v14  ;;  %vm140_vm6 = vcmp.eq.s32.totalorder %v135_v39, %v2291_v29  ;;  %vm102_vm4 = vcmp.eq.s32.totalorder %v2334_v63, %v2291_v29 }
  0xa1   :  { %317 = vperm.xlu1 %1977, %v2190_v8   ;;  %v1652_v49 = vsel %vm140_vm6, 1.0, %v2019_v6 }
  0xa3   :  { %v2338_v1 = vpop.permute.xlu0 %121 }
  0xa4   :  { %v186_v41 = vpop.permute.xlu1 %185 }
  0xa5   :  { %v196_v42 = vmul.f32 %v1654_v40, %v186_v41  ;;  %337 = vperm.xlu1 %1977, %v2198_v10  }
  0xa7   :  { %v2310_v43 = vadd.f32 %v196_v42, %v163_v38 }
  0xa8   :  { %v204_v4 = vpop.permute.xlu0 %203 }
  0xa9   :  { %1978 = vset.pattern.permute.xlu1 %v2025_v17  ;;  %v117_v45 = vpop.permute.xlu1 %116  ;;  %vm211_vm7 = vcmp.eq.s32.totalorder %v204_v4, %v2291_v29 }
  0xaa   :  { %373 = vperm.xlu1 %1978, %v2198_v10   ;;  %v125_v51 = vmul.f32 %v1649_v47, %v117_v45  ;;  %v1657_v17 = vsel %vm211_vm7, 1.0, %v2019_v6 }
  0xac   :  { %v207_v7 = vpop.permute.xlu0 %206 }
  0xad   :  { %vm212_vm13 = vcmp.eq.s32.totalorder %v207_v7, %v2291_v29 }
  0xae   :  { %v154_v50 = vpop.permute.xlu1 %153  ;;  %v1658_v37 = vsel %vm212_vm13, 1.0, %v2019_v6  ;;  %vm510_vm13 = vcmask 261120  }
  0xaf   :  { %v161_v52 = vmul.f32 %v1652_v49, %v154_v50 }
  0xb0   :  { %v226_v9 = vpop.permute.xlu0 %225 }
  0xb1   :  { %v2322_v53 = vadd.f32 %v161_v52, %v125_v51  ;;  %v233_v44 = vmul.f32 %v1658_v37, %v226_v9 }
  0xb3   :  { %v222_v54 = vpop.permute.xlu1 %221 }
  0xb4   :  { %v232_v20 = vmul.f32 %v1657_v17, %v222_v54 }
  0xb5   :  { %v312_v11 = vpop.permute.xlu0 %311 }
  0xb6   :  { %vm319_vm10 = vcmp.eq.s32.totalorder %v312_v11, %v2291_v29  ;;  %v235_v27 = vadd.f32 %v232_v20, %v2310_v43 }
  0xb7   :  { %v1666_v25 = vsel %vm319_vm10, 1.0, %v2019_v6 }
  0xb8   :  { %v240_v55 = vpop.permute.xlu1 %239 }
  0xb9   :  { %vm247_vm8 = vcmp.eq.s32.totalorder %v240_v55, %v2291_v29 }
  0xba   :  { %v298_v13 = vpop.permute.xlu0 %297  ;;  %v1660_v21 = vsel %vm247_vm8, 1.0, %v2019_v6 }
  0xbd   :  { %v2328_v57 = vpop.permute.xlu1 %137 }
  0xbe   :  { %vm141_vm6 = vcmp.eq.s32.totalorder %v2328_v57, %v2291_v29 }
  0xbf   :  { %v262_v15 = vpop.permute.xlu0 %261  ;;  %v1653_v2 = vsel %vm141_vm6, 1.0, %v2019_v6 }
  0xc2   :  { %v190_v58 = vpop.permute.xlu1 %189 }
  0xc3   :  { %v2352_v18 = vpop.permute.xlu0 %265  ;;  %v197_v30 = vmul.f32 %v1655_v32, %v190_v58 }
  0xc5   :  { %v200_v43 = vadd.f32 %v197_v30, %v2322_v53 }
  0xc7   :  { %v258_v59 = vpop.permute.xlu1 %257  ;;  %v236_v49 = vadd.f32 %v233_v44, %v200_v43 }
  0xc8   :  { %v348_v22 = vpop.permute.xlu0 %347  ;;  %v268_v23 = vmul.f32 %v1660_v21, %v258_v59 }
  0xc9   :  { %vm355_vm12 = vcmp.eq.s32.totalorder %v348_v22, %v2291_v29 }
  0xca   :  { %v271_v33 = vadd.f32 %v268_v23, %v235_v27  ;;  %v1669_v35 = vsel %vm355_vm12, 1.0, %v2019_v6  ;;  %v500_v27 = vld [vmem:[%s2984_s30 + $0x8] sm:$0xff] }
  0xcb   :  { %1824 = vmatpush3.msra.mxu1 %v500_v27 }
  0xcc   :  { %v276_v61 = vpop.permute.xlu1 %275  ;;  %v351_v42 = vpop.permute.xlu0 %350  ;;  %1825 = vmatprep.subr.mxu1 %v2019_v6 }
  0xcd   :  { %vm283_vm9 = vcmp.eq.s32.totalorder %v276_v61, %v2291_v29  ;;  %vm356_vm2 = vcmp.eq.s32.totalorder %v351_v42, %v2291_v29  ;;  %v607_v42 = vld [vmem:[%s2985_s7 + $0x18] sm:$0xff] }
  0xce   :  { %387 = vadd.xlane.f32.xlu1 %v386_v60  ;;  %v1663_v24 = vsel %vm283_vm9, 1.0, %v2019_v6  ;;  %v1670_v51 = vsel %vm356_vm2, 1.0, %v2019_v6  ;;  %v1650_v60 = vsel %vm102_vm4, 1.0, %v2019_v6 }
  0xcf   :  { %v126_v63 = vmul.f32 %v1650_v60, %v2338_v1  ;;  %v816_v60 = vld [vmem:[%s2987_s12] sm:$0xff] }
  0xd0   :  { %v370_v52 = vpop.permute.xlu0 %369 }
  0xd1   :  { %v2332_v62 = vpop.permute.xlu1 %157  ;;  %v377_v59 = vmul.f32 %v1670_v51, %v370_v52 }
  0xd6   :  { %v2336_v0 = vpop.permute.xlu1 %173 }
  0xd7   :  { %vm177_vm7 = vcmp.eq.s32.totalorder %v2336_v0, %v2291_v29 }
  0xd8   :  { %v1656_v57 = vsel %vm177_vm7, 1.0, %v2019_v6 }
  0xdb   :  { %v243_v3 = vpop.permute.xlu1 %242 }
  0xdc   :  { %vm248_vm14 = vcmp.eq.s32.totalorder %v243_v3, %v2291_v29 }
  0xdd   :  { %v1661_v41 = vsel %vm248_vm14, 1.0, %v2019_v6 }
  0xde   :  { %v269_v47 = vmul.f32 %v1661_v41, %v262_v15  ;;  %v608_v41 = vld [vmem:[%s2985_s7 + $0x20] sm:$0xff] }
  0xe0   :  { %v294_v5 = vpop.permute.xlu1 %293  ;;  %v272_v53 = vadd.f32 %v269_v47, %v236_v49 }
  0xe1   :  { %v304_v28 = vmul.f32 %v1663_v24, %v294_v5  ;;  %v162_v5 = vmul.f32 %v1653_v2, %v2332_v62  ;;  %v615_v2 = vld [vmem:[%s2988_s28 + $0x10] sm:$0xff] }
  0xe3   :  { %v307_v36 = vadd.f32 %v304_v28, %v271_v33  ;;  %v165_v62 = vadd.f32 %v162_v5, %v126_v63  ;;  %v1675_v63 = vld [vmem:[%s2989_s3] ss:$0 sm:$0xff]  ;;  %s2027_s3 = smov 32  }
  0xe5   :  { %v2344_v8 = vpop.permute.xlu1 %193 }
  0xe6   :  { %v198_v0 = vmul.f32 %v1656_v57, %v2344_v8 }
  0xe8   :  { %v201_v11 = vadd.f32 %v198_v0, %v165_v62 }
  0xea   :  { %v2346_v10 = vpop.permute.xlu1 %209 }
  0xeb   :  { %vm213_vm8 = vcmp.eq.s32.totalorder %v2346_v10, %v2291_v29 }
  0xec   :  { %v1659_v7 = vsel %vm213_vm8, 1.0, %v2019_v6 }
  0xef   :  { %v279_v12 = vpop.permute.xlu1 %278 }
  0xf0   :  { %vm284_vm15 = vcmp.eq.s32.totalorder %v279_v12, %v2291_v29 }
  0xf1   :  { %v1664_v46 = vsel %vm284_vm15, 1.0, %v2019_v6 }
  0xf2   :  { %v305_v50 = vmul.f32 %v1664_v46, %v298_v13  ;;  %v354_v13 = vpop.permute.xlu0 %353 }
  0xf3   :  { %vm357_vm12 = vcmp.eq.s32.totalorder %v354_v13, %v2291_v29  ;;  %v1679_v13 = vld [vmem:[%s2990_s4] ss:$0 sm:$0xff] }
  0xf4   :  { %v330_v14 = vpop.permute.xlu1 %329  ;;  %v308_v56 = vadd.f32 %v305_v50, %v272_v53  ;;  %v1671_v23 = vsel %vm357_vm12, 1.0, %v2019_v6  ;;  %v604_v50 = vld [vmem:[%s2985_s7] sm:$0xff] }
  0xf5   :  { %v340_v34 = vmul.f32 %v1666_v25, %v330_v14 }
  0xf7   :  { %v343_v39 = vadd.f32 %v340_v34, %v307_v36  ;;  %v611_v36 = vld [vmem:[%s2985_s7 + $0x38] sm:$0xff] }
  0xf9   :  { %v2349_v16 = vpop.permute.xlu1 %229 }
  0xfa   :  { %v234_v9 = vmul.f32 %v1659_v7, %v2349_v16 }
  0xfc   :  { %v237_v14 = vadd.f32 %v234_v9, %v201_v11 }
  0xfe   :  { %v2355_v19 = vpop.permute.xlu1 %245 }
  0xff   :  { %vm249_vm9 = vcmp.eq.s32.totalorder %v2355_v19, %v2291_v29 }
 0x100   :  { %v1662_v1 = vsel %vm249_vm9, 1.0, %v2019_v6 }
 0x101   :  { %v270_v12 = vmul.f32 %v1662_v1, %v2352_v18  ;;  %v385_v28 = vpop.xlane.xlu0 %384 }
 0x103   :  { %v315_v31 = vpop.permute.xlu1 %314  ;;  %v273_v20 = vadd.f32 %v270_v12, %v237_v14 }
 0x104   :  { %vm320_vm3 = vcmp.eq.s32.totalorder %v315_v31, %v2291_v29  ;;  %v392_v31 = vmax.f32 %v385_v28, 1e-09  ;;  %v824_v28 = vld [vmem:[%s2949_s14 + $0x18] sm:$0xff] }
 0x105   :  { %v1667_v54 = vsel %vm320_vm3, 1.0, %v2019_v6 }
 0x106   :  { %1979 = vrcp.f32 %v392_v31  ;;  %v823_v31 = vld [vmem:[%s2949_s14 + $0x10] sm:$0xff] }
 0x108   :  { %v366_v38 = vpop.permute.xlu1 %365 }
 0x109   :  { %v376_v40 = vmul.f32 %v1669_v35, %v366_v38  ;;  %v610_v38 = vld [vmem:[%s2985_s7 + $0x30] sm:$0xff] }
 0x10b   :  { %v379_v45 = vadd.f32 %v376_v40, %v343_v39  ;;  %v609_v39 = vld [vmem:[%s2985_s7 + $0x28] sm:$0xff]  ;;  %v391_v40 = vpop.xlane.xlu0 %390 }
 0x10c   :  { %v394_v44 = vmax.f32 %v391_v40, 1e-09 }
 0x10d   :  { %v282_v48 = vpop.permute.xlu1 %281  ;;  %1811 = vmatmul.mubr.msk.f32.vlgmr.msra.gmra.mxu0 %vm403_vm1, %v379_v45  ;;  %v606_v45 = vld [vmem:[%s2985_s7 + $0x10] sm:$0xff] }
 0x10e   :  { %1813 = vmatprep.mubr.msk.f32.mxu0 %vm2026_vm0, %v2019_v6  ;;  %vm285_vm10 = vcmp.eq.s32.totalorder %v282_v48, %v2291_v29  ;;  %v605_v48 = vld [vmem:[%s2985_s7 + $0x8] sm:$0xff] }
 0x10f   :  { %v1665_v8 = vsel %vm285_vm10, 1.0, %v2019_v6 }
 0x112   :  { %v334_v55 = vpop.permute.xlu1 %333 }
 0x113   :  { %v341_v58 = vmul.f32 %v1667_v54, %v334_v55  ;;  %v1980_v34 = vpop.eup %1979  ;;  %v603_v55 = vld [vmem:[%s2986_s0] sm:$0xff] }
 0x115   :  { %v344_v61 = vadd.f32 %v341_v58, %v308_v56  ;;  %v819_v56 = vld [vmem:[%s2987_s12 + $0x18] sm:$0xff]  ;;  %v818_v58 = vld [vmem:[%s2987_s12 + $0x10] sm:$0xff] }
 0x117   :  { %v380_v3 = vadd.f32 %v377_v59, %v344_v61  ;;  %v302_v4 = vpop.permute.xlu1 %301  ;;  %v817_v59 = vld [vmem:[%s2987_s12 + $0x8] sm:$0xff]  ;;  %v616_v61 = vld [vmem:[%s2988_s28 + $0x18] sm:$0xff] }
 0x118   :  { %v306_v15 = vmul.f32 %v1665_v8, %v302_v4  ;;  %1856 = vmatpush3.msra.mxu0 %v616_v61  ;;  %v613_v4 = vld [vmem:[%s2988_s28] sm:$0xff] }
 0x119   :  { %1814 = vmatmul.mubr.msk.f32.gmra.mxu0 %vm403_vm1, %v380_v3  ;;  %1857 = vmatprep.subr.mxu0 %v2019_v6  ;;  %v614_v3 = vld [vmem:[%s2988_s28 + $0x8] sm:$0xff] }
 0x11a   :  { %1816 = vmatprep.mubr.msk.f32.mxu0 %vm2026_vm0, %v2019_v6  ;;  %v309_v21 = vadd.f32 %v306_v15, %v273_v20  ;;  %1858 = vmatpush3.msra.mxu0 %v615_v2  ;;  %v1190_v2 = vld [vmem:[%s2951_s19 + $0x30] sm:$0xff] }
 0x11b   :  { %1859 = vmatprep.subr.mxu0 %v2019_v6 }
 0x11c   :  { %v318_v10 = vpop.permute.xlu1 %317  ;;  %1860 = vmatpush3.msra.mxu0 %v614_v3 }
 0x11d   :  { %vm321_vm11 = vcmp.eq.s32.totalorder %v318_v10, %v2291_v29  ;;  %v499_v29 = vld [vmem:[%s2984_s30] sm:$0xff]  ;;  %1861 = vmatprep.subr.mxu0 %v2019_v6 }
 0x11e   :  { %v1668_v19 = vsel %vm321_vm11, 1.0, %v2019_v6  ;;  %1826 = vmatpush3.msra.mxu1 %v499_v29  ;;  %1862 = vmatpush3.msra.mxu0 %v613_v4 }
 0x11f   :  { %1836 = vmatprep.subr.mxu1 %v2019_v6  ;;  %1883 = vmatprep.subr.mxu0 %v2019_v6 }
 0x120   :  { %v338_v17 = vpop.permute.xlu1 %337 }
 0x121   :  { %v342_v16 = vmul.f32 %v1668_v19, %v338_v17 }
 0x123   :  { %v345_v24 = vadd.f32 %v342_v16, %v309_v21 }
 0x125   :  { %v374_v22 = vpop.permute.xlu1 %373 }
 0x126   :  { %v378_v18 = vmul.f32 %v1671_v23, %v374_v22 }
 0x128   :  { %v381_v25 = vadd.f32 %v378_v18, %v345_v24  ;;  %v2530_v24 = vld [vmem:[%s2948_s18] sm:$0xff] }
 0x12a   :  { %1817 = vmatmul.mubr.msk.f32.gmra.mxu0 %vm403_vm1, %v381_v25 }
 0x12b   :  { %1863 = vmatprep.mubr.msk.f32.mxu0 %vm2026_vm0, %v2019_v6 }
 0x157   :  { %v388_v32 = vpop.xlane.xlu1 %387 }
 0x158   :  { %v393_v33 = vmax.f32 %v388_v32, 1e-09  ;;  %v822_v32 = vld [vmem:[%s2949_s14 + $0x8] sm:$0xff] }
 0x15a   :  { %1981 = vrcp.f32 %v393_v33  ;;  %v821_v33 = vld [vmem:[%s2949_s14] sm:$0xff] }
 0x15b   :  { %1983 = vrcp.f32 %v394_v44 }
 0x167   :  { %v1982_v43 = vpop.eup %1981 }
 0x168   :  { %v1984_v51 = vpop.eup %1983 }
 0x1cd   :  { %v479_v35 = vpop.f32.mrf.mxu0 }
 0x1ce   :  { %v494_v30 = vmul.f32 %v1980_v34, %v479_v35  ;;  %v1685_v34 = vld [vmem:[%s2950_s13] ss:$0 sm:$0xff] }
 0x1cf   :  { %v1812_v37 = vpop.f32.mrf.mxu0 }
 0x1d0   :  { %1828 = vmatmul.mubr.msk.f32.vlgmr.msra.gmra.mxu1 %vm510_vm13, %v494_v30 }
 0x1d1   :  { %1830 = vmatprep.mubr.msk.f32.mxu1 %vm2026_vm0, %v2019_v6  ;;  %1837 = vmatpush3.msra.mxu1 %v611_v36 }
 0x1d2   :  { %1838 = vmatprep.subr.mxu1 %v2019_v6 }
 0x1d3   :  { %1839 = vmatpush3.msra.mxu1 %v610_v38 }
 0x1d4   :  { %1840 = vmatprep.subr.mxu1 %v2019_v6 }
 0x1d5   :  { %1841 = vmatpush3.msra.mxu1 %v609_v39 }
 0x1d6   :  { %1842 = vmatprep.subr.mxu1 %v2019_v6 }
 0x1d7   :  { %1843 = vmatpush3.msra.mxu1 %v608_v41 }
 0x1d8   :  { %1844 = vmatprep.subr.mxu1 %v2019_v6 }
 0x1d9   :  { %v484_v46 = vpop.f32.mrf.mxu0  ;;  %1845 = vmatpush3.msra.mxu1 %v607_v42 }
 0x1da   :  { %v496_v47 = vmul.f32 %v1982_v43, %v484_v46  ;;  %1846 = vmatprep.subr.mxu1 %v2019_v6 }
 0x1db   :  { %v1815_v49 = vpop.f32.mrf.mxu0  ;;  %1847 = vmatpush3.msra.mxu1 %v606_v45 }
 0x1dc   :  { %1831 = vmatmul.mubr.msk.f32.gmra.mxu1 %vm510_vm13, %v496_v47  ;;  %1848 = vmatprep.subr.mxu1 %v2019_v6 }
 0x1dd   :  { %1833 = vmatprep.mubr.msk.f32.mxu1 %vm2026_vm0, %v2019_v6  ;;  %1849 = vmatpush3.msra.mxu1 %v605_v48 }
 0x1de   :  { %1850 = vmatprep.subr.mxu1 %v2019_v6 }
 0x1df   :  { %1851 = vmatpush3.msra.mxu1 %v604_v50 }
 0x1e0   :  { %1866 = vmatprep.subr.mxu1 %v2019_v6 }
 0x1ea   :  { %v489_v52 = vpop.f32.mrf.mxu0 }
 0x1eb   :  { %v498_v53 = vmul.f32 %v1984_v51, %v489_v52 }
 0x1ec   :  { %v1818_v54 = vpop.f32.mrf.mxu0 }
 0x1ed   :  { %1834 = vmatmul.mubr.msk.f32.gmra.mxu1 %vm510_vm13, %v498_v53 }
 0x1ee   :  { %1852 = vmatprep.mubr.msk.f32.mxu1 %vm2026_vm0, %v2019_v6 }
 0x1f1   :  { %1853 = vmatmul.mubr.msk.f32.vlgmr.msra.gmra.mxu1 %vm403_vm1, %v603_v55 }
 0x1f2   :  { %1874 = vmatprep.mubr.msk.f32.mxu1 %vm2026_vm0, %v2019_v6  ;;  %1867 = vmatpush3.msra.mxu1 %v819_v56 }
 0x1f3   :  { %1868 = vmatprep.subr.mxu1 %v2019_v6 }
 0x1f4   :  { %1869 = vmatpush3.msra.mxu1 %v818_v58 }
 0x1f5   :  { %1870 = vmatprep.subr.mxu1 %v2019_v6 }
 0x1f6   :  { %1871 = vmatpush3.msra.mxu1 %v817_v59  ;;  %v1191_v59 = vld [vmem:[%s2951_s19 + $0x38] sm:$0xff] }
 0x1f7   :  { %1872 = vmatprep.subr.mxu1 %v2019_v6 }
 0x1f8   :  { %1873 = vmatpush3.msra.mxu1 %v816_v60 }
 0x1f9   :  { %1900 = vmatprep.subr.mxu1 %v2019_v6 }
 0x290   :  { %v586_v5 = vpop.f32.mrf.mxu1 }
 0x291   :  { %v587_v57 = vadd.f32 %v1675_v63, %v586_v5 }
 0x292   :  { %v1829_v0 = vpop.f32.mrf.mxu1 }
 0x293   :  { %1985 = vtanh.f32 %v587_v57  ;;  %v1188_v0 = vld [vmem:[%s2951_s19 + $0x20] sm:$0xff] }
 0x29c   :  { %v591_v7 = vpop.f32.mrf.mxu1 }
 0x29d   :  { %v592_v1 = vadd.f32 %v1675_v63, %v591_v7 }
 0x29e   :  { %v1832_v62 = vpop.f32.mrf.mxu1 }
 0x29f   :  { %1987 = vtanh.f32 %v592_v1  ;;  %v1187_v62 = vld [vmem:[%s2951_s19 + $0x18] sm:$0xff] }
 0x2a0   :  { %v2504_v9 = vpop.eup %1985 }
 0x2a1   :  { %1875 = vmatmul.mubr.msk.f32.vlgmr.msra.gmra.mxu1 %vm510_vm13, %v2504_v9 }
 0x2a2   :  { %1901 = vmatpush3.msra.mxu1 %v2504_v9  ;;  %1877 = vmatprep.mubr.msk.f32.mxu1 %vm2026_vm0, %v2019_v6 }
 0x2a3   :  { %1924 = vmatprep.subr.mxu1 %v2019_v6 }
 0x2ac   :  { %v1988_v10 = vpop.eup %1987 }
 0x2ad   :  { %v596_v11 = vpop.f32.mrf.mxu1  ;;  %1878 = vmatmul.mubr.msk.f32.gmra.mxu1 %vm510_vm13, %v1988_v10 }
 0x2ae   :  { %v597_v12 = vadd.f32 %v1675_v63, %v596_v11  ;;  %1880 = vmatprep.mubr.msk.f32.mxu1 %vm2026_vm0, %v2019_v6  ;;  %v1189_v63 = vld [vmem:[%s2951_s19 + $0x28] sm:$0xff] }
 0x2af   :  { %v1835_v8 = vpop.f32.mrf.mxu1 }
 0x2b0   :  { %1989 = vtanh.f32 %v597_v12  ;;  %v1186_v12 = vld [vmem:[%s2951_s19 + $0x10] sm:$0xff]  ;;  %v1185_v8 = vld [vmem:[%s2951_s19 + $0x8] sm:$0xff] }
 0x2b1   :  { %v695_v14 = vpop.f32.mrf.mxu1 }
 0x2b2   :  { %v2518_v15 = vadd.f32 %v1679_v13, %v695_v14  ;;  %v1184_v13 = vld [vmem:[%s2951_s19] sm:$0xff] }
 0x2b3   :  { %v1854_v17 = vpop.f32.mrf.mxu1 }
 0x2b4   :  { %v699_v19 = vmul.f32 %v2518_v15, %v2518_v15 }
 0x2b6   :  { %v700_v20 = vmul.f32 %v699_v19, %v2518_v15  ;;  %v1681_v19 = vld [vmem:[%s2952_s9] ss:$0 sm:$0xff] }
 0x2b8   :  { %v701_v16 = vmul.f32 0.044715, %v700_v20 }
 0x2ba   :  { %v702_v21 = vadd.f32 %v701_v16, %v2518_v15 }
 0x2bc   :  { %v703_v22 = vmul.f32 0.7978846, %v702_v21 }
 0x2bd   :  { %v1990_v23 = vpop.eup %1989 }
 0x2be   :  { %1991 = vtanh.f32 %v703_v22  ;;  %1881 = vmatmul.mubr.msk.f32.gmra.mxu1 %vm510_vm13, %v1990_v23 }
 0x2bf   :  { %1902 = vmatprep.mubr.msk.f32.mxu1 %vm2026_vm0, %v2019_v6 }
 0x2c2   :  { %1903 = vmatmul.mubr.msk.f32.vlgmr.msra.gmra.mxu1 %vm382_vm5, %v2530_v24 }
 0x2c3   :  { %1926 = vmatprep.mubr.msk.f32.mxu1 %vm2026_vm0, %v2019_v6 }
 0x2cb   :  { %v1992_v18 = vpop.eup %1991 }
 0x2cc   :  { %v705_v25 = vadd.f32 1.0, %v1992_v18 }
 0x2ce   :  { %v706_v27 = vmul.f32 0.5, %v705_v25 }
 0x2d0   :  { %v707_v29 = vmul.f32 %v706_v27, %v2518_v15 }
 0x2d2   :  { %1864 = vmatmul.mubr.msk.f32.vlgmr.msra.gmra.mxu0 %vm510_vm13, %v707_v29 }
 0x2d3   :  { %1891 = vmatprep.mubr.msk.f32.mxu0 %vm2026_vm0, %v2019_v6  ;;  %1884 = vmatpush3.msra.mxu0 %v824_v28 }
 0x2d4   :  { %1885 = vmatprep.subr.mxu0 %v2019_v6 }
 0x2d5   :  { %1886 = vmatpush3.msra.mxu0 %v823_v31 }
 0x2d6   :  { %1887 = vmatprep.subr.mxu0 %v2019_v6 }
 0x2d7   :  { %1888 = vmatpush3.msra.mxu0 %v822_v32 }
 0x2d8   :  { %1889 = vmatprep.subr.mxu0 %v2019_v6 }
 0x2d9   :  { %1890 = vmatpush3.msra.mxu0 %v821_v33 }
 0x2da   :  { %1905 = vmatprep.subr.mxu0 %v2019_v6 }
 0x361   :  { %v909_v35 = vpop.f32.mrf.mxu1 }
 0x362   :  { %v2559_v30 = vadd.f32 %v1685_v34, %v909_v35 }
 0x363   :  { %v1876_v36 = vpop.f32.mrf.mxu1 }
 0x364   :  { %v923_v37 = vmul.f32 %v2559_v30, %v2559_v30 }
 0x366   :  { %v926_v38 = vmul.f32 %v923_v37, %v2559_v30 }
 0x368   :  { %v929_v39 = vmul.f32 0.044715, %v926_v38 }
 0x36a   :  { %v932_v40 = vadd.f32 %v929_v39, %v2559_v30 }
 0x36c   :  { %v935_v41 = vmul.f32 0.7978846, %v932_v40 }
 0x36d   :  { %v914_v42 = vpop.f32.mrf.mxu1 }
 0x36e   :  { %1993 = vtanh.f32 %v935_v41  ;;  %v2565_v43 = vadd.f32 %v1685_v34, %v914_v42 }
 0x36f   :  { %v1879_v44 = vpop.f32.mrf.mxu1 }
 0x370   :  { %v924_v45 = vmul.f32 %v2565_v43, %v2565_v43 }
 0x372   :  { %v927_v46 = vmul.f32 %v924_v45, %v2565_v43 }
 0x374   :  { %v930_v47 = vmul.f32 0.044715, %v927_v46 }
 0x376   :  { %v933_v48 = vadd.f32 %v930_v47, %v2565_v43 }
 0x378   :  { %v936_v49 = vmul.f32 0.7978846, %v933_v48 }
 0x37a   :  { %1995 = vtanh.f32 %v936_v49 }
 0x37b   :  { %v1994_v50 = vpop.eup %1993 }
 0x37c   :  { %v941_v51 = vadd.f32 1.0, %v1994_v50 }
 0x37e   :  { %v919_v52 = vpop.f32.mrf.mxu1  ;;  %v944_v53 = vmul.f32 0.5, %v941_v51 }
 0x37f   :  { %v2571_v54 = vadd.f32 %v1685_v34, %v919_v52 }
 0x380   :  { %v1882_v55 = vpop.f32.mrf.mxu1  ;;  %v947_v56 = vmul.f32 %v944_v53, %v2559_v30 }
 0x381   :  { %v925_v58 = vmul.f32 %v2571_v54, %v2571_v54 }
 0x382   :  { %1892 = vmatmul.mubr.msk.f32.vlgmr.msra.gmra.mxu0 %vm510_vm13, %v947_v56  ;;  %v1175_v60 = vpop.f32.mrf.mxu1  ;;  %v1379_v56 = vld [vmem:[%s2956_s21 + $0xf8] sm:$0xff] }
 0x383   :  { %v928_v61 = vmul.f32 %v925_v58, %v2571_v54  ;;  %1180 = vrot.lane.b32.xlu0 %v1175_v60, %s2027_s3  ;;  %1894 = vmatprep.mubr.msk.f32.mxu0 %vm2026_vm0, %v2019_v6  ;;  %v1378_v58 = vld [vmem:[%s2956_s21 + $0xf0] sm:$0xff]  ;;  %v1376_v60 = vld [vmem:[%s2956_s21 + $0xe0] sm:$0xff] }
 0x384   :  { %v1904_v3 = vpop.f32.mrf.mxu1  ;;  %1906 = vmatpush3.msra.mxu0 %v1191_v59  ;;  %v1377_v59 = vld [vmem:[%s2956_s21 + $0xe8] sm:$0xff] }
 0x385   :  { %v931_v4 = vmul.f32 0.044715, %v928_v61  ;;  %1907 = vmatprep.subr.mxu0 %v2019_v6  ;;  %v1375_v61 = vld [vmem:[%s2956_s21 + $0xd8] sm:$0xff]  ;;  %v1373_v3 = vld [vmem:[%s2956_s21 + $0xc8] sm:$0xff] }
 0x386   :  { %1908 = vmatpush3.msra.mxu0 %v1190_v2  ;;  %v1374_v2 = vld [vmem:[%s2956_s21 + $0xd0] sm:$0xff] }
 0x387   :  { %v1996_v5 = vpop.eup %1995  ;;  %v934_v57 = vadd.f32 %v931_v4, %v2571_v54  ;;  %1909 = vmatprep.subr.mxu0 %v2019_v6  ;;  %v1372_v4 = vld [vmem:[%s2956_s21 + $0xc0] sm:$0xff] }
 0x388   :  { %v942_v7 = vadd.f32 1.0, %v1996_v5  ;;  %1910 = vmatpush3.msra.mxu0 %v1189_v63  ;;  %v1371_v63 = vld [vmem:[%s2956_s21 + $0xb8] sm:$0xff]  ;;  %v1370_v5 = vld [vmem:[%s2956_s21 + $0xb0] sm:$0xff] }
 0x389   :  { %v937_v1 = vmul.f32 0.7978846, %v934_v57  ;;  %1911 = vmatprep.subr.mxu0 %v2019_v6  ;;  %v1369_v57 = vld [vmem:[%s2956_s21 + $0xa8] sm:$0xff] }
 0x38a   :  { %v945_v10 = vmul.f32 0.5, %v942_v7  ;;  %1912 = vmatpush3.msra.mxu0 %v1188_v0  ;;  %v1368_v0 = vld [vmem:[%s2956_s21 + $0xa0] sm:$0xff]  ;;  %v1367_v7 = vld [vmem:[%s2956_s21 + $0x98] sm:$0xff] }
 0x38b   :  { %1997 = vtanh.f32 %v937_v1  ;;  %1913 = vmatprep.subr.mxu0 %v2019_v6  ;;  %v1366_v1 = vld [vmem:[%s2956_s21 + $0x90] sm:$0xff] }
 0x38c   :  { %v948_v11 = vmul.f32 %v945_v10, %v2565_v43  ;;  %1914 = vmatpush3.msra.mxu0 %v1187_v62  ;;  %v1365_v62 = vld [vmem:[%s2956_s21 + $0x88] sm:$0xff]  ;;  %v1364_v10 = vld [vmem:[%s2956_s21 + $0x80] sm:$0xff] }
 0x38d   :  { %1915 = vmatprep.subr.mxu0 %v2019_v6 }
 0x38e   :  { %1895 = vmatmul.mubr.msk.f32.gmra.mxu0 %vm510_vm13, %v948_v11  ;;  %v1363_v11 = vld [vmem:[%s2956_s21 + $0x78] sm:$0xff] }
 0x38f   :  { %1897 = vmatprep.mubr.msk.f32.mxu0 %vm2026_vm0, %v2019_v6  ;;  %1916 = vmatpush3.msra.mxu0 %v1186_v12  ;;  %v1362_v12 = vld [vmem:[%s2956_s21 + $0x70] sm:$0xff] }
 0x390   :  { %1917 = vmatprep.subr.mxu0 %v2019_v6 }
 0x391   :  { %1918 = vmatpush3.msra.mxu0 %v1185_v8  ;;  %v1361_v8 = vld [vmem:[%s2956_s21 + $0x68] sm:$0xff] }
 0x392   :  { %v783_v14 = vpop.f32.mrf.mxu0  ;;  %1919 = vmatprep.subr.mxu0 %v2019_v6 }
 0x393   :  { %1920 = vmatpush3.msra.mxu0 %v1184_v13  ;;  %v784_v16 = vadd.f32 %v1681_v19, %v783_v14  ;;  %v1360_v13 = vld [vmem:[%s2956_s21 + $0x60] sm:$0xff]  ;;  %v1359_v14 = vld [vmem:[%s2956_s21 + $0x58] sm:$0xff]  ;;  %v1357_v19 = vld [vmem:[%s2956_s21 + $0x48] sm:$0xff] }
 0x394   :  { %v1865_v17 = vpop.f32.mrf.mxu0 }
 0x395   :  { %v2621_v18 = vadd.f32 %v784_v16, %v2518_v15  ;;  %v1689_v15 = vld [vmem:[%s2953_s15] ss:$0 sm:$0xff]  ;;  %v1358_v17 = vld [vmem:[%s2956_s21 + $0x50] sm:$0xff]  ;;  %v1355_v16 = vld [vmem:[%s2956_s21 + $0x38] sm:$0xff] }
 0x397   :  { %v788_v25 = vsel %vm510_vm13, %v2621_v18, 0.0 }
 0x398   :  { %v1998_v20 = vpop.eup %1997 }
 0x399   :  { %v943_v21 = vadd.f32 1.0, %v1998_v20  ;;  %v1356_v20 = vld [vmem:[%s2956_s21 + $0x40] sm:$0xff] }
 0x39b   :  { %v946_v22 = vmul.f32 0.5, %v943_v21  ;;  %v1354_v21 = vld [vmem:[%s2956_s21 + $0x30] sm:$0xff] }
 0x39d   :  { %v949_v23 = vmul.f32 %v946_v22, %v2571_v54  ;;  %v1353_v22 = vld [vmem:[%s2956_s21 + $0x28] sm:$0xff] }
 0x39f   :  { %1898 = vmatmul.mubr.msk.f32.gmra.mxu0 %vm510_vm13, %v949_v23  ;;  %v1352_v23 = vld [vmem:[%s2956_s21 + $0x20] sm:$0xff] }
 0x3a0   :  { %1921 = vmatprep.mubr.msk.f32.mxu0 %vm2026_vm0, %v2019_v6  ;;  %vm1620_vm0 = vcmask 15360  }
 0x3a2   :  { %789 = vadd.xlane.f32.xlu0 %v788_v25  ;;  %v1351_v25 = vld [vmem:[%s2956_s21 + $0x18] sm:$0xff] }
 0x3f5   :  { %v1181_v27 = vpop.permute.xlu0 %1180 }
 0x3f6   :  { %v1183_v29 = vsel %vm510_vm13, %v2504_v9, %v1181_v27  ;;  %v1350_v27 = vld [vmem:[%s2956_s21 + $0x10] sm:$0xff] }
 0x3f7   :  { %1922 = vmatmul.mubr.msk.f32.vlgmr.msra.gmra.mxu0 %vm403_vm1, %v1183_v29  ;;  %v1349_v29 = vld [vmem:[%s2956_s21 + $0x8] sm:$0xff] }
 0x42b   :  { %v2671_v47 = vpop.xlane.xlu0 %789 }
 0x442   :  { %v1031_v28 = vpop.f32.mrf.mxu0 }
 0x443   :  { %v1032_v31 = vadd.f32 %v1689_v15, %v1031_v28 }
 0x444   :  { %v1893_v32 = vpop.f32.mrf.mxu0 }
 0x445   :  { %v1045_v33 = vadd.f32 %v1032_v31, %v2559_v30  ;;  %v1696_v30 = vld [vmem:[%s2955_s20] ss:$0 sm:$0xff] }
 0x446   :  { %v1348_v32 = vld [vmem:[%s2956_s21] sm:$0xff] }
 0x447   :  { %v1048_v34 = vsel %vm510_vm13, %v1045_v33, 0.0 }
 0x448   :  { %1049 = vadd.xlane.f32.xlu0 %v1048_v34  ;;  %v2782_v34 = vld [vmem:[%s2957_s16] ss:$0 sm:$0xff] }
 0x44e   :  { %v1036_v35 = vpop.f32.mrf.mxu0 }
 0x44f   :  { %v2636_v36 = vadd.f32 %v1689_v15, %v1036_v35 }
 0x450   :  { %v1896_v37 = vpop.f32.mrf.mxu0 }
 0x451   :  { %v2788_v37 = vld [vmem:[%s2958_s17] ss:$0 sm:$0xff] }
 0x45f   :  { %v1041_v38 = vpop.f32.mrf.mxu0 }
 0x460   :  { %v1042_v9 = vadd.f32 %v1689_v15, %v1041_v38 }
 0x461   :  { %v1899_v39 = vpop.f32.mrf.mxu0 }
 0x462   :  { %v1047_v40 = vadd.f32 %v1042_v9, %v2571_v54 }
 0x464   :  { %v1054_v41 = vsel %vm510_vm13, %v1047_v40, 0.0 }
 0x465   :  { %1055 = vadd.xlane.f32.xlu0 %v1054_v41 }
 0x4b7   :  { %v1268_v42 = vpop.f32.mrf.mxu0 }
 0x4b8   :  { %v2663_v44 = vadd.f32 %v1696_v30, %v1268_v42 }
 0x4b9   :  { %v1923_v45 = vpop.f32.mrf.mxu0 }
 0x4ba   :  { %v1272_v46 = vmax.f32 %v2663_v44, 0.0  ;;  %v1516_v44 = vld [vmem:[%s2959_s23 + $0x70] sm:$0xff] }
 0x4bc   :  { %1925 = vmatpush3.msra.mxu1 %v1272_v46 }
 0x4bd   :  { %1927 = vmatmul.mubr.msk.f32.vlgmr.msra.gmra.mxu1 %vm382_vm5, %v2530_v24  ;;  %1392 = vmatprep.subr.mxu1 %v1379_v56  ;;  %v1514_v56 = vld [vmem:[%s2959_s23 + $0x60] sm:$0xff] }
 0x4be   :  { %1456 = vmatprep.mubr.f32.mxu1 %v2019_v6  ;;  %1393 = vmatpush1.msra.mxu1 %v1378_v58  ;;  %v1529_v58 = vld [vmem:[%s2959_s23 + $0xd8] sm:$0xff] }
 0x4bf   :  { %1394 = vmatprep.subr.mxu1 %v1377_v59  ;;  %v1513_v59 = vld [vmem:[%s2959_s23 + $0x58] sm:$0xff] }
 0x4c0   :  { %1395 = vmatpush1.msra.mxu1 %v1376_v60  ;;  %v1528_v60 = vld [vmem:[%s2959_s23 + $0xd0] sm:$0xff] }
 0x4c1   :  { %1396 = vmatprep.subr.mxu1 %v1375_v61  ;;  %v1512_v61 = vld [vmem:[%s2959_s23 + $0x50] sm:$0xff] }
 0x4c2   :  { %1397 = vmatpush1.msra.mxu1 %v1374_v2  ;;  %v1527_v2 = vld [vmem:[%s2959_s23 + $0xc8] sm:$0xff] }
 0x4c3   :  { %1398 = vmatprep.subr.mxu1 %v1373_v3  ;;  %v1511_v3 = vld [vmem:[%s2959_s23 + $0x48] sm:$0xff] }
 0x4c4   :  { %1399 = vmatpush1.msra.mxu1 %v1372_v4  ;;  %v1526_v4 = vld [vmem:[%s2959_s23 + $0xc0] sm:$0xff] }
 0x4c5   :  { %1400 = vmatprep.subr.mxu1 %v1371_v63  ;;  %v1510_v63 = vld [vmem:[%s2959_s23 + $0x40] sm:$0xff] }
 0x4c6   :  { %1401 = vmatpush1.msra.mxu1 %v1370_v5  ;;  %v1525_v5 = vld [vmem:[%s2959_s23 + $0xb8] sm:$0xff] }
 0x4c7   :  { %1402 = vmatprep.subr.mxu1 %v1369_v57  ;;  %v1509_v57 = vld [vmem:[%s2959_s23 + $0x38] sm:$0xff] }
 0x4c8   :  { %1403 = vmatpush1.msra.mxu1 %v1368_v0  ;;  %v1524_v0 = vld [vmem:[%s2959_s23 + $0xb0] sm:$0xff] }
 0x4c9   :  { %1404 = vmatprep.subr.mxu1 %v1367_v7  ;;  %v1508_v7 = vld [vmem:[%s2959_s23 + $0x30] sm:$0xff] }
 0x4ca   :  { %1405 = vmatpush1.msra.mxu1 %v1366_v1  ;;  %v1523_v1 = vld [vmem:[%s2959_s23 + $0xa8] sm:$0xff] }
 0x4cb   :  { %1406 = vmatprep.subr.mxu1 %v1365_v62  ;;  %v1507_v62 = vld [vmem:[%s2959_s23 + $0x28] sm:$0xff] }
 0x4cc   :  { %1407 = vmatpush1.msra.mxu1 %v1364_v10  ;;  %v1522_v10 = vld [vmem:[%s2959_s23 + $0xa0] sm:$0xff] }
 0x4cd   :  { %1408 = vmatprep.subr.mxu1 %v1363_v11  ;;  %v1506_v11 = vld [vmem:[%s2959_s23 + $0x20] sm:$0xff] }
 0x4ce   :  { %1409 = vmatpush1.msra.mxu1 %v1362_v12  ;;  %v1521_v12 = vld [vmem:[%s2959_s23 + $0x98] sm:$0xff] }
 0x4cf   :  { %1410 = vmatprep.subr.mxu1 %v1361_v8  ;;  %v1505_v8 = vld [vmem:[%s2959_s23 + $0x18] sm:$0xff] }
 0x4d0   :  { %1411 = vmatpush1.msra.mxu1 %v1360_v13  ;;  %v1520_v13 = vld [vmem:[%s2959_s23 + $0x90] sm:$0xff] }
 0x4d1   :  { %v1050_v48 = vpop.xlane.xlu0 %1049  ;;  %1412 = vmatprep.subr.mxu1 %v1359_v14  ;;  %v1504_v14 = vld [vmem:[%s2959_s23 + $0x10] sm:$0xff] }
 0x4d2   :  { %v1057_v49 = vmul.f32 0.03125, %v1050_v48  ;;  %1413 = vmatpush1.msra.mxu1 %v1358_v17  ;;  %v1519_v17 = vld [vmem:[%s2959_s23 + $0x88] sm:$0xff] }
 0x4d3   :  { %1414 = vmatprep.subr.mxu1 %v1357_v19  ;;  %v1503_v19 = vld [vmem:[%s2959_s23 + $0x8] sm:$0xff] }
 0x4d4   :  { %v2673_v50 = vsub.f32 %v1045_v33, %v1057_v49  ;;  %1415 = vmatpush1.msra.mxu1 %v1356_v20  ;;  %v1518_v20 = vld [vmem:[%s2959_s23 + $0x80] sm:$0xff] }
 0x4d5   :  { %1416 = vmatprep.subr.mxu1 %v1355_v16  ;;  %v1502_v16 = vld [vmem:[%s2959_s23] sm:$0xff] }
 0x4d6   :  { %v1063_v51 = vmul.f32 %v2673_v50, %v2673_v50  ;;  %1417 = vmatpush1.msra.mxu1 %v1354_v21  ;;  %v1383_v21 = vshrl.u32 %v89_v26, 7 }
 0x4d7   :  { %1418 = vmatprep.subr.mxu1 %v1353_v22 }
 0x4d8   :  { %v1066_v52 = vsel %vm510_vm13, %v1063_v51, 0.0  ;;  %1419 = vmatpush1.msra.mxu1 %v1352_v23  ;;  %v1384_v22 = vsub.s32 0, %v1383_v21  ;;  %v1380_v23 = vld [vmem:[%s2960_s22] sm:$0x3] }
 0x4d9   :  { %1067 = vadd.xlane.f32.xlu0 %v1066_v52  ;;  %1420 = vmatprep.subr.mxu1 %v1351_v25  ;;  %v1388_v25 = vsub.s32 1, %v1383_v21 }
 0x4da   :  { %1421 = vmatpush1.msra.mxu1 %v1350_v27  ;;  %v1385_v27 = vrot.slane %v1380_v23, %v1384_v22 }
 0x4db   :  { %1422 = vmatprep.subr.mxu1 %v1349_v29  ;;  %v1389_v29 = vrot.slane %v1380_v23, %v1388_v25  ;;  %v792_v23 = vmul.f32 0.03125, %v2671_v47 }
 0x4dc   :  { %1423 = vmatpush1.msra.mxu1 %v1348_v32 }
 0x4ee   :  { %v1056_v53 = vpop.xlane.xlu0 %1055 }
 0x4ef   :  { %v1059_v54 = vmul.f32 0.03125, %v1056_v53  ;;  %v1533_v53 = vld [vmem:[%s2959_s23 + $0xf8] sm:$0xff] }
 0x4f0   :  { %1759 = vmatprep.subr.mxu0 %v1533_v53 }
 0x4f1   :  { %v2678_v55 = vsub.f32 %v1047_v40, %v1059_v54  ;;  %v1517_v54 = vld [vmem:[%s2959_s23 + $0x78] sm:$0xff] }
 0x4f2   :  { %1760 = vmatpush3.msra.mxu0 %v1517_v54 }
 0x4f3   :  { %v1065_v24 = vmul.f32 %v2678_v55, %v2678_v55 }
 0x4f5   :  { %v1072_v6 = vsel %vm510_vm13, %v1065_v24, 0.0  ;;  %v1515_v24 = vld [vmem:[%s2959_s23 + $0x68] sm:$0xff] }
 0x4f6   :  { %1073 = vadd.xlane.f32.xlu0 %v1072_v6  ;;  %v1530_v6 = vld [vmem:[%s2959_s23 + $0xe0] sm:$0xff] }
 0x562   :  { %v1068_v15 = vpop.xlane.xlu0 %1067 }
 0x563   :  { %v1075_v28 = vmul.f32 0.03125, %v1068_v15 }
 0x565   :  { %v1078_v31 = vadd.f32 1e-05, %v1075_v28 }
 0x567   :  { %1999 = vrsqrt.f32 %v1078_v31 }
 0x574   :  { %v2000_v33 = vpop.eup %1999 }
 0x575   :  { %v1084_v35 = vmul.f32 %v2000_v33, %v2673_v50 }
 0x577   :  { %v1093_v38 = vmul.f32 %v2782_v34, %v1084_v35 }
 0x579   :  { %v1102_v9 = vadd.f32 %v2788_v37, %v1093_v38 }
 0x57b   :  { %1640 = vst.msk [vmem:[%s2954_s25 + $0x8] sm:$0xff] %vm510_vm13, %v1102_v9 }
 0x57d   :  { %v1339_v39 = vpop.f32.mrf.mxu1 }
 0x57e   :  { %1344 = vrot.lane.b32.xlu1 %v1339_v39, %s2028_s2 }
 0x57f   :  { %v1074_v40 = vpop.xlane.xlu0 %1073  ;;  %v1928_v41 = vpop.f32.mrf.mxu1 }
 0x580   :  { %v1077_v30 = vmul.f32 0.03125, %v1074_v40 }
 0x582   :  { %v1080_v42 = vadd.f32 1e-05, %v1077_v30 }
 0x584   :  { %2001 = vrsqrt.f32 %v1080_v42 }
 0x591   :  { %v2002_v45 = vpop.eup %2001 }
 0x592   :  { %v1086_v48 = vmul.f32 %v2002_v45, %v2678_v55  ;;  %v1532_v55 = vld [vmem:[%s2959_s23 + $0xf0] sm:$0xff] }
 0x593   :  { %1761 = vmatprep.subr.mxu0 %v1532_v55 }
 0x594   :  { %v1095_v49 = vmul.f32 %v2782_v34, %v1086_v48  ;;  %1762 = vmatpush3.msra.mxu0 %v1516_v44 }
 0x596   :  { %v1104_v50 = vadd.f32 %v2788_v37, %v1095_v49 }
 0x598   :  { %1642 = vst.msk [vmem:[%s2954_s25 + $0x18] sm:$0xff] %vm510_vm13, %v1104_v50 }
 0x5f0   :  { %v1345_v51 = vpop.permute.xlu1 %1344 }
 0x5f1   :  { %v1347_v52 = vsel %vm403_vm1, %v1272_v46, %v1345_v51  ;;  %v1531_v46 = vld [vmem:[%s2959_s23 + $0xe8] sm:$0xff] }
 0x5f2   :  { %1457 = vmatmul.mubr.f32.vlgmr.msra.gmra.mxu1 %v1347_v52  ;;  %1763 = vmatprep.subr.mxu0 %v1531_v46 }
 0x5f3   :  { %1764 = vmatpush3.msra.mxu0 %v1515_v24 }
 0x5f4   :  { %1765 = vmatprep.subr.mxu0 %v1530_v6 }
 0x5f5   :  { %1766 = vmatpush3.msra.mxu0 %v1514_v56 }
 0x5f6   :  { %1767 = vmatprep.subr.mxu0 %v1529_v58 }
 0x5f7   :  { %1768 = vmatpush3.msra.mxu0 %v1513_v59 }
 0x5f8   :  { %1769 = vmatprep.subr.mxu0 %v1528_v60 }
 0x5f9   :  { %1770 = vmatpush3.msra.mxu0 %v1512_v61 }
 0x5fa   :  { %1771 = vmatprep.subr.mxu0 %v1527_v2 }
 0x5fb   :  { %1772 = vmatpush3.msra.mxu0 %v1511_v3 }
 0x5fc   :  { %1773 = vmatprep.subr.mxu0 %v1526_v4 }
 0x5fd   :  { %1774 = vmatpush3.msra.mxu0 %v1510_v63 }
 0x5fe   :  { %1775 = vmatprep.subr.mxu0 %v1525_v5 }
 0x5ff   :  { %1776 = vmatpush3.msra.mxu0 %v1509_v57 }
 0x600   :  { %1777 = vmatprep.subr.mxu0 %v1524_v0 }
 0x601   :  { %1778 = vmatpush3.msra.mxu0 %v1508_v7 }
 0x602   :  { %1779 = vmatprep.subr.mxu0 %v1523_v1 }
 0x603   :  { %1780 = vmatpush3.msra.mxu0 %v1507_v62 }
 0x604   :  { %1781 = vmatprep.subr.mxu0 %v1522_v10 }
 0x605   :  { %1782 = vmatpush3.msra.mxu0 %v1506_v11  ;;  %v1699_v11 = vld [vmem:[%s2961_s24] ss:$0 sm:$0xff] }
 0x606   :  { %1783 = vmatprep.subr.mxu0 %v1521_v12 }
 0x607   :  { %1784 = vmatpush3.msra.mxu0 %v1505_v8 }
 0x608   :  { %1785 = vmatprep.subr.mxu0 %v1520_v13 }
 0x609   :  { %1786 = vmatpush3.msra.mxu0 %v1504_v14 }
 0x60a   :  { %1787 = vmatprep.subr.mxu0 %v1519_v17 }
 0x60b   :  { %1788 = vmatpush3.msra.mxu0 %v1503_v19 }
 0x60c   :  { %1789 = vmatprep.subr.mxu0 %v1518_v20 }
 0x60d   :  { %1790 = vmatpush3.msra.mxu0 %v1502_v16 }
 0x6b2   :  { %v1458_v15 = vpop.f32.mrf.mxu1 }
 0x6b3   :  { %v1459_v28 = vadd.f32 %v1458_v15, %v1385_v27 }
 0x6b4   :  { %v1460_v31 = vpop.f32.mrf.mxu1 }
 0x6b5   :  { %v1463_v32 = vrot.slane %v1459_v28, 4  ;;  %v1461_v33 = vadd.f32 %v1460_v31, %v1389_v29  ;;  %v793_v29 = vsub.f32 %v2621_v18, %v792_v23 }
 0x6b7   :  { %v1464_v35 = vadd.f32 %v1463_v32, %v1459_v28  ;;  %v1469_v38 = vrot.slane %v1461_v33, 4  ;;  %v794_v32 = vmul.f32 %v793_v29, %v793_v29 }
 0x6b9   :  { %v1465_v9 = vrot.slane %v1464_v35, 2  ;;  %v1470_v39 = vadd.f32 %v1469_v38, %v1461_v33 }
 0x6bb   :  { %v1466_v40 = vadd.f32 %v1465_v9, %v1464_v35  ;;  %v1471_v41 = vrot.slane %v1470_v39, 2 }
 0x6bd   :  { %v1467_v26 = vrot.slane %v1466_v40, 1  ;;  %v1472_v30 = vadd.f32 %v1471_v41, %v1470_v39 }
 0x6bf   :  { %v1468_v42 = vadd.f32 %v1467_v26, %v1466_v40  ;;  %v1473_v45 = vrot.slane %v1472_v30, 1 }
 0x6c1   :  { %v1476_v48 = vmul.f32 0.125, %v1468_v42  ;;  %v1474_v49 = vadd.f32 %v1473_v45, %v1472_v30 }
 0x6c3   :  { %v1478_v50 = vsub.f32 %v1459_v28, %v1476_v48  ;;  %v1477_v51 = vmul.f32 0.125, %v1474_v49  ;;  %v1046_v28 = vadd.f32 %v2636_v36, %v2565_v43  ;;  %v1683_v48 = vld [vmem:[%s2962_s10] ss:$0 sm:$0xff] }
 0x6c5   :  { %v1480_v52 = vmul.f32 %v1478_v50, %v1478_v50  ;;  %v1479_v53 = vsub.f32 %v1461_v33, %v1477_v51  ;;  %v1051_v31 = vsel %vm510_vm13, %v1046_v28, 0.0  ;;  %v795_v33 = vsel %vm510_vm13, %v794_v32, 0.0 }
 0x6c7   :  { %v1482_v54 = vrot.slane %v1480_v52, 4  ;;  %v1481_v55 = vmul.f32 %v1479_v53, %v1479_v53 }
 0x6c9   :  { %v1483_v44 = vadd.f32 %v1482_v54, %v1480_v52  ;;  %v1488_v46 = vrot.slane %v1481_v55, 4 }
 0x6cb   :  { %v1484_v24 = vrot.slane %v1483_v44, 2  ;;  %v1489_v6 = vadd.f32 %v1488_v46, %v1481_v55 }
 0x6cd   :  { %v1485_v56 = vadd.f32 %v1484_v24, %v1483_v44  ;;  %v1490_v58 = vrot.slane %v1489_v6, 2 }
 0x6cf   :  { %v1486_v59 = vrot.slane %v1485_v56, 1  ;;  %v1491_v60 = vadd.f32 %v1490_v58, %v1489_v6 }
 0x6d1   :  { %v1487_v61 = vadd.f32 %v1486_v59, %v1485_v56  ;;  %v1492_v2 = vrot.slane %v1491_v60, 1 }
 0x6d3   :  { %v1494_v3 = vmul.f32 0.125, %v1487_v61  ;;  %v1493_v4 = vadd.f32 %v1492_v2, %v1491_v60 }
 0x6d5   :  { %v1496_v63 = vadd.f32 1e-05, %v1494_v3  ;;  %v1495_v5 = vmul.f32 0.125, %v1493_v4 }
 0x6d7   :  { %v1497_v57 = vadd.f32 1e-05, %v1495_v5  ;;  %2003 = vrsqrt.f32 %v1496_v63 }
 0x6d9   :  { %2005 = vrsqrt.f32 %v1497_v57 }
 0x6e4   :  { %v2004_v0 = vpop.eup %2003 }
 0x6e5   :  { %v1500_v62 = vmul.f32 %v2004_v0, %v1478_v50  ;;  %v1684_v50 = vld [vmem:[%s2963_s11] ss:$0 sm:$0xff] }
 0x6e6   :  { %v2006_v7 = vpop.eup %2005 }
 0x6e7   :  { %v1501_v1 = vmul.f32 %v2006_v7, %v1479_v53 }
 0x6e9   :  { %1605 = vmatprep.mubr.f32.mxu0 %v1501_v1 }
 0x6ea   :  { %1606 = vmatmul.mubr.f32.vlgmr.msra.gmra.mxu0 %v1500_v62 }
 0x7aa   :  { %v1791_v10 = vpop.f32.mrf.mxu0 }
 0x7ac   :  { %v1792_v12 = vpop.f32.mrf.mxu0 }
 0x7ad   :  { %v1793_v8 = vadd.f32 %v1792_v12, %v1791_v10 }
 0x7af   :  { %v1608_v13 = vadd.f32 %v1793_v8, %v1699_v11 }
 0x7b1   :  { %v1611_v14 = vmul.f32 %v1608_v13, %v1608_v13 }
 0x7b3   :  { %v1612_v17 = vmul.f32 %v1611_v14, %v1608_v13 }
 0x7b5   :  { %v1613_v19 = vmul.f32 0.044715, %v1612_v17 }
 0x7b7   :  { %v1614_v20 = vadd.f32 %v1613_v19, %v1608_v13 }
 0x7b9   :  { %v1615_v16 = vmul.f32 0.7978846, %v1614_v20 }
 0x7bb   :  { %2007 = vtanh.f32 %v1615_v16 }
 0x7c8   :  { %v2008_v21 = vpop.eup %2007 }
 0x7c9   :  { %v1617_v22 = vadd.f32 1.0, %v2008_v21 }
 0x7cb   :  { %v1618_v25 = vmul.f32 0.5, %v1617_v22 }
 0x7cd   :  { %v1619_v27 = vmul.f32 %v1618_v25, %v1608_v13 }
 0x7cf   :  { %v1621_v15 = vsel %vm1620_vm0, %v1619_v27, -inf }
 0x7d0   :  { %1622 = vmax.xlane.f32.xlu1 %v1621_v15 }
 0x7d4   :  { %1052 = vadd.xlane.f32.xlu1 %v1051_v31 }
 0x7d8   :  { %796 = vadd.xlane.f32.xlu1 %v795_v33 }
 0x859   :  { %v1623_v35 = vpop.xlane.xlu1 %1622 }
 0x85a   :  { %v1624_v47 = vsub.f32 %v1619_v27, %v1623_v35 }
 0x85c   :  { %v1625_v38 = vmul.f32 1.442695, %v1624_v47 }
 0x85d   :  { %v1053_v9 = vpop.xlane.xlu1 %1052 }
 0x85e   :  { %2009 = vpow2.f32 %v1625_v38  ;;  %v1058_v39 = vmul.f32 0.03125, %v1053_v9 }
 0x860   :  { %v1061_v18 = vsub.f32 %v1046_v28, %v1058_v39 }
 0x861   :  { %v797_v40 = vpop.xlane.xlu1 %796 }
 0x862   :  { %v798_v41 = vmul.f32 0.03125, %v797_v40  ;;  %v1064_v26 = vmul.f32 %v1061_v18, %v1061_v18 }
 0x864   :  { %v799_v30 = vadd.f32 1e-05, %v798_v41  ;;  %v1069_v43 = vsel %vm510_vm13, %v1064_v26, 0.0 }
 0x865   :  { %1070 = vadd.xlane.f32.xlu1 %v1069_v43 }
 0x866   :  { %2011 = vrsqrt.f32 %v799_v30 }
 0x86b   :  { %v2010_v36 = vpop.eup %2009 }
 0x86c   :  { %v1627_v42 = vsel %vm1620_vm0, %v2010_v36, 0.0 }
 0x86d   :  { %1628 = vadd.xlane.f32.xlu1 %v1627_v42 }
 0x873   :  { %v2012_v45 = vpop.eup %2011 }
 0x874   :  { %v801_v49 = vmul.f32 %v2012_v45, %v793_v29 }
 0x876   :  { %v808_v51 = vmul.f32 %v1683_v48, %v801_v49 }
 0x878   :  { %v815_v52 = vadd.f32 %v1684_v50, %v808_v51 }
 0x87a   :  { %1639 = vst.msk [vmem:[%s2954_s25] sm:$0xff] %vm510_vm13, %v815_v52 }
 0x8ee   :  { %v1071_v53 = vpop.xlane.xlu1 %1070 }
 0x8ef   :  { %v1076_v54 = vmul.f32 0.03125, %v1071_v53 }
 0x8f1   :  { %v1079_v55 = vadd.f32 1e-05, %v1076_v54 }
 0x8f3   :  { %2013 = vrsqrt.f32 %v1079_v55 }
 0x8f6   :  { %v1629_v44 = vpop.xlane.xlu1 %1628 }
 0x8f7   :  { %2015 = vlog2.f32 %v1629_v44 }
 0x900   :  { %v2014_v46 = vpop.eup %2013 }
 0x901   :  { %v1085_v24 = vmul.f32 %v2014_v46, %v1061_v18 }
 0x903   :  { %v1094_v6 = vmul.f32 %v2782_v34, %v1085_v24 }
 0x904   :  { %v2016_v56 = vpop.eup %2015 }
 0x905   :  { %v1103_v58 = vadd.f32 %v2788_v37, %v1094_v6  ;;  %v1631_v59 = vmul.f32 0.6931472, %v2016_v56 }
 0x907   :  { %1641 = vst.msk [vmem:[%s2954_s25 + $0x10] sm:$0xff] %vm510_vm13, %v1103_v58  ;;  %v1632_v60 = vadd.f32 %v1631_v59, %v1623_v35 }
 0x909   :  { %v1633_v61 = vsub.f32 %v1619_v27, %v1632_v60 }
 0x90b   :  { %1643 = vst.msk [vmem:[%s2954_s25 + $0x20] sm:$0xff] %vm1620_vm0, %v1633_v61 }

</bundles_post_ra>
